<compile_context>
chip_gen: v7x
topology: tpu7x:2x2x1
jax: 0.10.0
libtpu: 0.0.40
codegen_flags: <defaults>
</compile_context>

<pallas_src>
import functools

import jax
import jax.numpy as jnp
from jax.experimental import pallas as pl
from jax.experimental.pallas import tpu as pltpu

# ----------------------------- synthetic config -----------------------------
IMG_SIZE = (16, 16)
IMG_CHANNELS = 4
PATCH_SIZE = (4, 4)
VIT_WIDTH = 32
VIT_HEADS = 4
VIT_LAYERS = 2
R_MLP = 4
LATENT_DIM = 16
DROPOUT = 0.0          # eval-mode dropout == identity
LN_EPS = 1e-5

N_PATCHES = (IMG_SIZE[0] // PATCH_SIZE[0]) * (IMG_SIZE[1] // PATCH_SIZE[1])
SEQ_LEN = N_PATCHES + 1
HEAD_DIM = VIT_WIDTH // VIT_HEADS
PATCH_DIM = IMG_CHANNELS * PATCH_SIZE[0] * PATCH_SIZE[1]


# ------------------------------ fused kernel ---------------------------------
def _ln(x, g, b, eps=LN_EPS):
    mean = jnp.mean(x, axis=-1, keepdims=True)
    var = jnp.mean(jnp.square(x - mean), axis=-1, keepdims=True)
    return (x - mean) * jax.lax.rsqrt(var + eps) * g + b


def _encoder_kernel(
    # inputs
    patches_ref, patch_w_ref, base_ref, pre_g_ref, pre_b_ref,
    ln1_g_ref, ln1_b_ref, w_qkv_ref, b_qkv_ref, w_o_ref, b_o_ref,
    ln2_g_ref, ln2_b_ref, w_fc1_ref, b_fc1_ref, w_fc2_ref, b_fc2_ref,
    fin_g_ref, fin_b_ref, w_proj_ref,
    # outputs
    feat_ref, proj_ref,
    # scratch
    x_vmem,
):
    layer = pl.program_id(1)
    D, H, dh = VIT_WIDTH, VIT_HEADS, HEAD_DIM
    scale = 1.0 / (dh ** 0.5)

    # ---- layer 0: patch embedding + cls/pos add + pre-LN (VMEM resident) ----
    # patches has a zero row prepended per image, so the same matmul also
    # produces the cls-row slot; `base` holds [cls+pos0 ; pos[1:]+conv_bias].
    @pl.when(layer == 0)
    def _embed():
        seq = jnp.dot(patches_ref[0], patch_w_ref[...],
                      preferred_element_type=jnp.float32) + base_ref[...]
        x_vmem[...] = _ln(seq, pre_g_ref[...], pre_b_ref[...])

    # ---- transformer block for (batch, layer) -------------------------------
    # TODO(synk): TransformerBlock source not provided; standard pre-LN block
    # with [Q|K|V]-packed qkv weights assumed; the cond_width conditioning path
    # is unused in forward (block(x) called with no cond), so it is omitted.
    x = x_vmem[...]                                               # (S, D) f32

    h = _ln(x, ln1_g_ref[0], ln1_b_ref[0])
    qkv = jnp.dot(h.astype(jnp.bfloat16), w_qkv_ref[0],
                  preferred_element_type=jnp.float32) + b_qkv_ref[0]   # (S, 3D)
    q = qkv[:, :D] * scale            # fold 1/sqrt(dh) into q
    k = qkv[:, D:2 * D]
    v = qkv[:, 2 * D:]
    w_o = w_o_ref[0]                                              # (D, D) f32

    attn = jnp.zeros_like(x)
    for hh in range(H):               # statically unrolled; all VMEM resident
        lo, hi = hh * dh, (hh + 1) * dh
        s = jnp.dot(q[:, lo:hi], k[:, lo:hi].T,
                    preferred_element_type=jnp.float32)           # (S, S)
        s = s - jnp.max(s, axis=-1, keepdims=True)
        p = jnp.exp(s)
        p = p * pl.reciprocal(jnp.sum(p, axis=-1, keepdims=True), approx=True)
        oh = jnp.dot(p, v[:, lo:hi], preferred_element_type=jnp.float32)
        # merge heads directly into the output projection: concat_h(oh) @ W_o
        attn = attn + jnp.dot(oh, w_o[lo:hi, :],
                              preferred_element_type=jnp.float32)
    x = x + attn + b_o_ref[0]

    h = _ln(x, ln2_g_ref[0], ln2_b_ref[0])
    h = jnp.dot(h.astype(jnp.bfloat16), w_fc1_ref[0],
                preferred_element_type=jnp.float32) + b_fc1_ref[0]
    # TODO(synk): tanh-approx GELU assumed (PyTorch nn.GELU default is exact
    # erf; CLIP sometimes uses QuickGELU) — reference block source not given.
    h = jax.nn.gelu(h, approximate=True)
    h = jnp.dot(h.astype(jnp.bfloat16), w_fc2_ref[0],
                preferred_element_type=jnp.float32) + b_fc2_ref[0]
    x = x + h
    x_vmem[...] = x

    # ---- last layer: final LN + cls-token projection ------------------------
    @pl.when(layer == pl.num_programs(1) - 1)
    def _finalize():
        xf = _ln(x, fin_g_ref[...], fin_b_ref[...])
        feat_ref[0] = xf.astype(feat_ref.dtype)
        cls_tok = xf[0:1, :]
        proj_ref[0] = jnp.dot(cls_tok.astype(jnp.bfloat16), w_proj_ref[...],
                              preferred_element_type=jnp.float32
                              ).astype(proj_ref.dtype)


# ----------------------------- BlockSpec helpers ------------------------------
def _shared(shape):
    return pl.BlockSpec(shape, lambda b, l: (0,) * len(shape))


def _per_batch(shape):
    return pl.BlockSpec((1,) + shape, lambda b, l: (b, 0, 0))


def _per_layer(shape):
    return pl.BlockSpec((1,) + shape, lambda b, l: (l, 0, 0))


# --------------------------------- forward -----------------------------------
@functools.partial(jax.jit, static_argnames=("get_all_features",))
def image_encoder_forward(prep, x, get_all_features=False):
    # x: (B, C, H, W)  -- PyTorch NCHW convention
    B, C, Himg, Wimg = x.shape
    ph, pw = PATCH_SIZE
    D, S, L = VIT_WIDTH, SEQ_LEN, VIT_LAYERS

    # Patch extraction: Conv2d(C, D, kernel=patch, stride=patch) == matmul on
    # flattened patches.  A zero row is prepended per image so the in-kernel
    # matmul directly yields all S sequence rows (row 0 = cls slot).
    patches = x.reshape(B, C, Himg // ph, ph, Wimg // pw, pw)
    patches = patches.transpose(0, 2, 4, 1, 3, 5).reshape(B, N_PATCHES, PATCH_DIM)
    patches = jnp.pad(patches, ((0, 0), (1, 0), (0, 0))).astype(jnp.bfloat16)

    feat, proj = pl.pallas_call(
        _encoder_kernel,
        out_shape=(
            jax.ShapeDtypeStruct((B, S, D), jnp.float32),           # features
            jax.ShapeDtypeStruct((B, 1, LATENT_DIM), jnp.float32),  # projection
        ),
        grid=(B, L),
        in_specs=[
            _per_batch((S, PATCH_DIM)),                 # patches (+ zero cls row)
            _shared((PATCH_DIM, D)),                    # patch_w (bf16)
            _shared((S, D)),                            # base = cls/pos/conv-bias
            _shared((1, D)), _shared((1, D)),           # pre_ln g,b
            _per_layer((1, D)), _per_layer((1, D)),     # ln1 g,b
            _per_layer((D, 3 * D)), _per_layer((1, 3 * D)),          # qkv
            _per_layer((D, D)), _per_layer((1, D)),                  # out proj
            _per_layer((1, D)), _per_layer((1, D)),     # ln2 g,b
            _per_layer((D, R_MLP * D)), _per_layer((1, R_MLP * D)),  # fc1
            _per_layer((R_MLP * D, D)), _per_layer((1, D)),          # fc2
            _shared((1, D)), _shared((1, D)),           # final_ln g,b
            _shared((D, LATENT_DIM)),                   # projection (bf16)
        ],
        out_specs=(
            _per_batch((S, D)),
            _per_batch((1, LATENT_DIM)),
        ),
        scratch_shapes=[pltpu.VMEM((S, D), jnp.float32)],   # resident activations
        compiler_params=pltpu.CompilerParams(
            dimension_semantics=("parallel", "arbitrary")),
    )(
        patches, prep["patch_w"], prep["base"], prep["pre_g"], prep["pre_b"],
        prep["ln1_g"], prep["ln1_b"], prep["w_qkv"], prep["b_qkv"],
        prep["w_o"], prep["b_o"], prep["ln2_g"], prep["ln2_b"],
        prep["w_fc1"], prep["b_fc1"], prep["w_fc2"], prep["b_fc2"],
        prep["fin_g"], prep["fin_b"], prep["w_proj"],
    )
    if get_all_features:
        return feat
    return proj.reshape(B, LATENT_DIM)


# ------------------------------- init / prepare -------------------------------
def init_params(key):
    D, C, (ph, pw) = VIT_WIDTH, IMG_CHANNELS, PATCH_SIZE
    std = D ** (-0.5)
    keys = iter(jax.random.split(key, 8 + 8 * VIT_LAYERS))

    def nrm(shape, scale):
        return scale * jax.random.normal(next(keys), shape, jnp.float32)

    params = {
        "patch_w": nrm((D, C, ph, pw), std),
        "patch_b": jnp.zeros((D,), jnp.float32),
        "cls_token": nrm((1, 1, D), std),
        "pos": nrm((SEQ_LEN, D), std),
        "pre_ln_g": jnp.ones((D,), jnp.float32),
        "pre_ln_b": jnp.zeros((D,), jnp.float32),
        "final_ln_g": jnp.ones((D,), jnp.float32),
        "final_ln_b": jnp.zeros((D,), jnp.float32),
        "projection": nrm((D, LATENT_DIM), std),
        "layers": [],
    }
    for _ in range(VIT_LAYERS):
        params["layers"].append({
            "ln1_g": jnp.ones((D,), jnp.float32),
            "ln1_b": jnp.zeros((D,), jnp.float32),
            "ln2_g": jnp.ones((D,), jnp.float32),
            "ln2_b": jnp.zeros((D,), jnp.float32),
            "w_qkv": nrm((D, 3 * D), std),
            "b_qkv": jnp.zeros((3 * D,), jnp.float32),
            "w_o": nrm((D, D), std),
            "b_o": jnp.zeros((D,), jnp.float32),
            "w_fc1": nrm((D, R_MLP * D), std),
            "b_fc1": jnp.zeros((R_MLP * D,), jnp.float32),
            "w_fc2": nrm((R_MLP * D, D), std),
            "b_fc2": jnp.zeros((D,), jnp.float32),
        })
    return params


def prepare_params(params):
    """One-time host-side prep: stack per-layer weights as (L,...), transpose the
    patch conv weight, fold cls/pos/conv-bias into one `base` array, cast matmul
    weights to bf16 (f32 accumulation in-kernel)."""
    D, L = VIT_WIDTH, VIT_LAYERS
    f32, bf16 = jnp.float32, jnp.bfloat16

    def stack(name, dtype, row=False):
        a = jnp.stack([lp[name] for lp in params["layers"]]).astype(dtype)
        return a.reshape(L, 1, -1) if row else a

    cls = params["cls_token"].reshape(1, D)
    pos = params["pos"]
    patch_b = params["patch_b"].reshape(1, D)
    base = jnp.concatenate([cls + pos[0:1], pos[1:] + patch_b], axis=0)  # (S, D)

    return {
        "patch_w": params["patch_w"].reshape(D, PATCH_DIM).T.astype(bf16),
        "base": base.astype(f32),
        "pre_g": params["pre_ln_g"].reshape(1, D).astype(f32),
        "pre_b": params["pre_ln_b"].reshape(1, D).astype(f32),
        "ln1_g": stack("ln1_g", f32, row=True),
        "ln1_b": stack("ln1_b", f32, row=True),
        "w_qkv": stack("w_qkv", bf16),
        "b_qkv": stack("b_qkv", f32, row=True),
        "w_o": stack("w_o", f32),       # sliced per head in-kernel -> keep f32
        "b_o": stack("b_o", f32, row=True),
        "ln2_g": stack("ln2_g", f32, row=True),
        "ln2_b": stack("ln2_b", f32, row=True),
        "w_fc1": stack("w_fc1", bf16),
        "b_fc1": stack("b_fc1", f32, row=True),
        "w_fc2": stack("w_fc2", bf16),
        "b_fc2": stack("b_fc2", f32, row=True),
        "fin_g": params["final_ln_g"].reshape(1, D).astype(f32),
        "fin_b": params["final_ln_b"].reshape(1, D).astype(f32),
        "w_proj": params["projection"].astype(bf16),
    }


# ----------------------------------- main -------------------------------------
if __name__ == "__main__":
    key = jax.random.PRNGKey(0)
    pkey, xkey = jax.random.split(key)
    params = init_params(pkey)
    prep = prepare_params(params)
    x = jax.random.normal(xkey, (2, IMG_CHANNELS, IMG_SIZE[0], IMG_SIZE[1]),
                          jnp.float32)

    out = image_encoder_forward(prep, x)
    out = jax.block_until_ready(out)
    assert out.shape == (2, LATENT_DIM), out.shape
    assert jnp.all(jnp.isfinite(out))
    print("KERNEL_OK")
</pallas_src>

<mosaic_0001>
module attributes {stable_mosaic.version = 11 : i64} {
  func.func @_encoder_kernel(%arg0: i32, %arg1: i32, %arg2: memref<1x17x64xbf16, #tpu.memory_space<vmem>>, %arg3: memref<64x32xbf16, #tpu.memory_space<vmem>>, %arg4: memref<17x32xf32, #tpu.memory_space<vmem>>, %arg5: memref<1x32xf32, #tpu.memory_space<vmem>>, %arg6: memref<1x32xf32, #tpu.memory_space<vmem>>, %arg7: memref<1x1x32xf32, #tpu.memory_space<vmem>>, %arg8: memref<1x1x32xf32, #tpu.memory_space<vmem>>, %arg9: memref<1x32x96xbf16, #tpu.memory_space<vmem>>, %arg10: memref<1x1x96xf32, #tpu.memory_space<vmem>>, %arg11: memref<1x32x32xf32, #tpu.memory_space<vmem>>, %arg12: memref<1x1x32xf32, #tpu.memory_space<vmem>>, %arg13: memref<1x1x32xf32, #tpu.memory_space<vmem>>, %arg14: memref<1x1x32xf32, #tpu.memory_space<vmem>>, %arg15: memref<1x32x128xbf16, #tpu.memory_space<vmem>>, %arg16: memref<1x1x128xf32, #tpu.memory_space<vmem>>, %arg17: memref<1x128x32xbf16, #tpu.memory_space<vmem>>, %arg18: memref<1x1x32xf32, #tpu.memory_space<vmem>>, %arg19: memref<1x32xf32, #tpu.memory_space<vmem>>, %arg20: memref<1x32xf32, #tpu.memory_space<vmem>>, %arg21: memref<32x16xbf16, #tpu.memory_space<vmem>>, %arg22: memref<1x17x32xf32, #tpu.memory_space<vmem>>, %arg23: memref<1x1x16xf32, #tpu.memory_space<vmem>>, %arg24: memref<17x32xf32, #tpu.memory_space<vmem>>) attributes {dimension_semantics = [#tpu.dimension_semantics<parallel>, #tpu.dimension_semantics<arbitrary>], iteration_bounds = array<i64: 2, 2>, scalar_prefetch = 0 : i64, scratch_operands = 1 : i64, tpu.core_type = #tpu.core_type<tc>, window_params = [{transform_indices = @transform_0, window_bounds = array<i64: 1, 17, 64>}, {pipeline_mode = #tpu.pipeline_mode<synchronous>, transform_indices = @transform_1, window_bounds = array<i64: 64, 32>}, {pipeline_mode = #tpu.pipeline_mode<synchronous>, transform_indices = @transform_2, window_bounds = array<i64: 17, 32>}, {pipeline_mode = #tpu.pipeline_mode<synchronous>, transform_indices = @transform_3, window_bounds = array<i64: 1, 32>}, {pipeline_mode = #tpu.pipeline_mode<synchronous>, transform_indices = @transform_4, window_bounds = array<i64: 1, 32>}, {transform_indices = @transform_5, window_bounds = array<i64: 1, 1, 32>}, {transform_indices = @transform_6, window_bounds = array<i64: 1, 1, 32>}, {transform_indices = @transform_7, window_bounds = array<i64: 1, 32, 96>}, {transform_indices = @transform_8, window_bounds = array<i64: 1, 1, 96>}, {transform_indices = @transform_9, window_bounds = array<i64: 1, 32, 32>}, {transform_indices = @transform_10, window_bounds = array<i64: 1, 1, 32>}, {transform_indices = @transform_11, window_bounds = array<i64: 1, 1, 32>}, {transform_indices = @transform_12, window_bounds = array<i64: 1, 1, 32>}, {transform_indices = @transform_13, window_bounds = array<i64: 1, 32, 128>}, {transform_indices = @transform_14, window_bounds = array<i64: 1, 1, 128>}, {transform_indices = @transform_15, window_bounds = array<i64: 1, 128, 32>}, {transform_indices = @transform_16, window_bounds = array<i64: 1, 1, 32>}, {pipeline_mode = #tpu.pipeline_mode<synchronous>, transform_indices = @transform_17, window_bounds = array<i64: 1, 32>}, {pipeline_mode = #tpu.pipeline_mode<synchronous>, transform_indices = @transform_18, window_bounds = array<i64: 1, 32>}, {pipeline_mode = #tpu.pipeline_mode<synchronous>, transform_indices = @transform_19, window_bounds = array<i64: 32, 16>}, {transform_indices = @transform_20, window_bounds = array<i64: 1, 17, 32>}, {transform_indices = @transform_21, window_bounds = array<i64: 1, 1, 16>}]} {
    %c0_i32 = arith.constant 0 : i32
    %0 = arith.cmpi eq, %arg1, %c0_i32 : i32
    %1 = arith.extui %0 : i1 to i32
    %c0_i32_0 = arith.constant 0 : i32
    %2 = arith.cmpi ne, %1, %c0_i32_0 : i32
    scf.if %2 {
      %c0_79 = arith.constant 0 : index
      %c0_80 = arith.constant 0 : index
      %c0_81 = arith.constant 0 : index
      %187 = vector.load %arg2[%c0_79, %c0_80, %c0_81] : memref<1x17x64xbf16, #tpu.memory_space<vmem>>, vector<1x17x64xbf16>
      %188 = vector.shape_cast %187 : vector<1x17x64xbf16> to vector<17x64xbf16>
      %c0_82 = arith.constant 0 : index
      %c0_83 = arith.constant 0 : index
      %189 = vector.load %arg3[%c0_82, %c0_83] : memref<64x32xbf16, #tpu.memory_space<vmem>>, vector<64x32xbf16>
      %cst_84 = arith.constant dense<0.000000e+00> : vector<17x32xf32>
      %190 = tpu.matmul %188, %189, %cst_84 {dimension_numbers = #tpu.dot_dimension_numbers<[1], [0], [0], [1], [0, 0, 1, 1], [], []>} : vector<17x64xbf16>, vector<64x32xbf16>, vector<17x32xf32> -> vector<17x32xf32>
      %c0_85 = arith.constant 0 : index
      %c0_86 = arith.constant 0 : index
      %191 = vector.load %arg4[%c0_85, %c0_86] : memref<17x32xf32, #tpu.memory_space<vmem>>, vector<17x32xf32>
      %192 = arith.addf %190, %191 : vector<17x32xf32>
      %c0_87 = arith.constant 0 : index
      %c0_88 = arith.constant 0 : index
      %193 = vector.load %arg5[%c0_87, %c0_88] : memref<1x32xf32, #tpu.memory_space<vmem>>, vector<1x32xf32>
      %c0_89 = arith.constant 0 : index
      %c0_90 = arith.constant 0 : index
      %194 = vector.load %arg6[%c0_89, %c0_90] : memref<1x32xf32, #tpu.memory_space<vmem>>, vector<1x32xf32>
      %cst_91 = arith.constant dense<0.000000e+00> : vector<17xf32>
      %195 = vector.multi_reduction <add>, %192, %cst_91 [1] : vector<17x32xf32> to vector<17xf32>
      %196 = vector.shape_cast %195 : vector<17xf32> to vector<17x1xf32>
      %cst_92 = arith.constant 3.200000e+01 : f32
      %197 = vector.broadcast %cst_92 : f32 to vector<17x1xf32>
      %198 = arith.divf %196, %197 : vector<17x1xf32>
      %199 = vector.broadcast %198 : vector<17x1xf32> to vector<17x32xf32>
      %200 = arith.subf %192, %199 : vector<17x32xf32>
      %201 = arith.mulf %200, %200 : vector<17x32xf32>
      %cst_93 = arith.constant dense<0.000000e+00> : vector<17xf32>
      %202 = vector.multi_reduction <add>, %201, %cst_93 [1] : vector<17x32xf32> to vector<17xf32>
      %203 = vector.shape_cast %202 : vector<17xf32> to vector<17x1xf32>
      %cst_94 = arith.constant 3.200000e+01 : f32
      %204 = vector.broadcast %cst_94 : f32 to vector<17x1xf32>
      %205 = arith.divf %203, %204 : vector<17x1xf32>
      %206 = vector.broadcast %198 : vector<17x1xf32> to vector<17x32xf32>
      %207 = arith.subf %192, %206 : vector<17x32xf32>
      %cst_95 = arith.constant 9.99999974E-6 : f32
      %208 = vector.broadcast %cst_95 : f32 to vector<17x1xf32>
      %209 = arith.addf %205, %208 : vector<17x1xf32>
      %210 = math.rsqrt %209 : vector<17x1xf32>
      %211 = vector.broadcast %210 : vector<17x1xf32> to vector<17x32xf32>
      %212 = arith.mulf %207, %211 : vector<17x32xf32>
      %213 = vector.broadcast %193 : vector<1x32xf32> to vector<17x32xf32>
      %214 = arith.mulf %212, %213 : vector<17x32xf32>
      %215 = vector.broadcast %194 : vector<1x32xf32> to vector<17x32xf32>
      %216 = arith.addf %214, %215 : vector<17x32xf32>
      %c0_96 = arith.constant 0 : index
      %c0_97 = arith.constant 0 : index
      %217 = vector.load %arg24[%c0_96, %c0_97] : memref<17x32xf32, #tpu.memory_space<vmem>>, vector<17x32xf32>
      tpu.vector_store %arg24[%c0_96, %c0_97], %216 {strides = array<i32>} : memref<17x32xf32, #tpu.memory_space<vmem>>, vector<17x32xf32>,
    } else {
    }
    %c0 = arith.constant 0 : index
    %c0_1 = arith.constant 0 : index
    %3 = vector.load %arg24[%c0, %c0_1] : memref<17x32xf32, #tpu.memory_space<vmem>>, vector<17x32xf32>
    %c0_2 = arith.constant 0 : index
    %c0_3 = arith.constant 0 : index
    %c0_4 = arith.constant 0 : index
    %4 = vector.load %arg7[%c0_2, %c0_3, %c0_4] : memref<1x1x32xf32, #tpu.memory_space<vmem>>, vector<1x1x32xf32>
    %5 = vector.shape_cast %4 : vector<1x1x32xf32> to vector<1x32xf32>
    %c0_5 = arith.constant 0 : index
    %c0_6 = arith.constant 0 : index
    %c0_7 = arith.constant 0 : index
    %6 = vector.load %arg8[%c0_5, %c0_6, %c0_7] : memref<1x1x32xf32, #tpu.memory_space<vmem>>, vector<1x1x32xf32>
    %7 = vector.shape_cast %6 : vector<1x1x32xf32> to vector<1x32xf32>
    %cst = arith.constant dense<0.000000e+00> : vector<17xf32>
    %8 = vector.multi_reduction <add>, %3, %cst [1] : vector<17x32xf32> to vector<17xf32>
    %9 = vector.shape_cast %8 : vector<17xf32> to vector<17x1xf32>
    %cst_8 = arith.constant 3.200000e+01 : f32
    %10 = vector.broadcast %cst_8 : f32 to vector<17x1xf32>
    %11 = arith.divf %9, %10 : vector<17x1xf32>
    %12 = vector.broadcast %11 : vector<17x1xf32> to vector<17x32xf32>
    %13 = arith.subf %3, %12 : vector<17x32xf32>
    %14 = arith.mulf %13, %13 : vector<17x32xf32>
    %cst_9 = arith.constant dense<0.000000e+00> : vector<17xf32>
    %15 = vector.multi_reduction <add>, %14, %cst_9 [1] : vector<17x32xf32> to vector<17xf32>
    %16 = vector.shape_cast %15 : vector<17xf32> to vector<17x1xf32>
    %cst_10 = arith.constant 3.200000e+01 : f32
    %17 = vector.broadcast %cst_10 : f32 to vector<17x1xf32>
    %18 = arith.divf %16, %17 : vector<17x1xf32>
    %19 = vector.broadcast %11 : vector<17x1xf32> to vector<17x32xf32>
    %20 = arith.subf %3, %19 : vector<17x32xf32>
    %cst_11 = arith.constant 9.99999974E-6 : f32
    %21 = vector.broadcast %cst_11 : f32 to vector<17x1xf32>
    %22 = arith.addf %18, %21 : vector<17x1xf32>
    %23 = math.rsqrt %22 : vector<17x1xf32>
    %24 = vector.broadcast %23 : vector<17x1xf32> to vector<17x32xf32>
    %25 = arith.mulf %20, %24 : vector<17x32xf32>
    %26 = vector.broadcast %5 : vector<1x32xf32> to vector<17x32xf32>
    %27 = arith.mulf %25, %26 : vector<17x32xf32>
    %28 = vector.broadcast %7 : vector<1x32xf32> to vector<17x32xf32>
    %29 = arith.addf %27, %28 : vector<17x32xf32>
    %30 = arith.truncf %29 : vector<17x32xf32> to vector<17x32xbf16>
    %c0_12 = arith.constant 0 : index
    %c0_13 = arith.constant 0 : index
    %c0_14 = arith.constant 0 : index
    %31 = vector.load %arg9[%c0_12, %c0_13, %c0_14] : memref<1x32x96xbf16, #tpu.memory_space<vmem>>, vector<1x32x96xbf16>
    %32 = vector.shape_cast %31 : vector<1x32x96xbf16> to vector<32x96xbf16>
    %cst_15 = arith.constant dense<0.000000e+00> : vector<17x96xf32>
    %33 = tpu.matmul %30, %32, %cst_15 {dimension_numbers = #tpu.dot_dimension_numbers<[1], [0], [0], [1], [0, 0, 1, 1], [], []>} : vector<17x32xbf16>, vector<32x96xbf16>, vector<17x96xf32> -> vector<17x96xf32>
    %c0_16 = arith.constant 0 : index
    %c0_17 = arith.constant 0 : index
    %c0_18 = arith.constant 0 : index
    %34 = vector.load %arg10[%c0_16, %c0_17, %c0_18] : memref<1x1x96xf32, #tpu.memory_space<vmem>>, vector<1x1x96xf32>
    %35 = vector.shape_cast %34 : vector<1x1x96xf32> to vector<1x96xf32>
    %36 = vector.broadcast %35 : vector<1x96xf32> to vector<17x96xf32>
    %37 = arith.addf %33, %36 : vector<17x96xf32>
    %38 = vector.extract_strided_slice %37 {offsets = [0, 0], sizes = [17, 32], strides = [1, 1]} : vector<17x96xf32> to vector<17x32xf32>
    %cst_19 = arith.constant 0.353553385 : f32
    %39 = vector.broadcast %cst_19 : f32 to vector<17x32xf32>
    %40 = arith.mulf %38, %39 : vector<17x32xf32>
    %41 = vector.extract_strided_slice %37 {offsets = [0, 32], sizes = [17, 32], strides = [1, 1]} : vector<17x96xf32> to vector<17x32xf32>
    %42 = vector.extract_strided_slice %37 {offsets = [0, 64], sizes = [17, 32], strides = [1, 1]} : vector<17x96xf32> to vector<17x32xf32>
    %c0_20 = arith.constant 0 : index
    %c0_21 = arith.constant 0 : index
    %c0_22 = arith.constant 0 : index
    %43 = vector.load %arg11[%c0_20, %c0_21, %c0_22] : memref<1x32x32xf32, #tpu.memory_space<vmem>>, vector<1x32x32xf32>
    %44 = vector.shape_cast %43 : vector<1x32x32xf32> to vector<32x32xf32>
    %cst_23 = arith.constant 0.000000e+00 : f32
    %45 = vector.broadcast %cst_23 : f32 to vector<17x32xf32>
    %46 = vector.extract_strided_slice %40 {offsets = [0, 0], sizes = [17, 8], strides = [1, 1]} : vector<17x32xf32> to vector<17x8xf32>
    %47 = vector.extract_strided_slice %41 {offsets = [0, 0], sizes = [17, 8], strides = [1, 1]} : vector<17x32xf32> to vector<17x8xf32>
    %48 = tpu.transpose %47, [1, 0] : vector<17x8xf32> -> vector<8x17xf32>
    %cst_24 = arith.constant dense<0.000000e+00> : vector<17x17xf32>
    %49 = tpu.matmul %46, %48, %cst_24 {dimension_numbers = #tpu.dot_dimension_numbers<[1], [0], [0], [1], [0, 0, 1, 1], [], []>} : vector<17x8xf32>, vector<8x17xf32>, vector<17x17xf32> -> vector<17x17xf32>
    %cst_25 = arith.constant dense<0xFF800000> : vector<17xf32>
    %50 = vector.multi_reduction <maximumf>, %49, %cst_25 [1] : vector<17x17xf32> to vector<17xf32>
    %51 = vector.shape_cast %50 : vector<17xf32> to vector<17x1xf32>
    %52 = vector.broadcast %51 : vector<17x1xf32> to vector<17x17xf32>
    %53 = arith.subf %49, %52 : vector<17x17xf32>
    %54 = math.exp %53 : vector<17x17xf32>
    %cst_26 = arith.constant dense<0.000000e+00> : vector<17xf32>
    %55 = vector.multi_reduction <add>, %54, %cst_26 [1] : vector<17x17xf32> to vector<17xf32>
    %56 = vector.shape_cast %55 : vector<17xf32> to vector<17x1xf32>
    %57 = tpu.reciprocal %56 {approx = true} : vector<17x1xf32> -> vector<17x1xf32>
    %58 = vector.broadcast %57 : vector<17x1xf32> to vector<17x17xf32>
    %59 = arith.mulf %54, %58 : vector<17x17xf32>
    %60 = vector.extract_strided_slice %42 {offsets = [0, 0], sizes = [17, 8], strides = [1, 1]} : vector<17x32xf32> to vector<17x8xf32>
    %cst_27 = arith.constant dense<0.000000e+00> : vector<17x8xf32>
    %61 = tpu.matmul %59, %60, %cst_27 {dimension_numbers = #tpu.dot_dimension_numbers<[1], [0], [0], [1], [0, 0, 1, 1], [], []>} : vector<17x17xf32>, vector<17x8xf32>, vector<17x8xf32> -> vector<17x8xf32>
    %62 = vector.extract_strided_slice %44 {offsets = [0, 0], sizes = [8, 32], strides = [1, 1]} : vector<32x32xf32> to vector<8x32xf32>
    %cst_28 = arith.constant dense<0.000000e+00> : vector<17x32xf32>
    %63 = tpu.matmul %61, %62, %cst_28 {dimension_numbers = #tpu.dot_dimension_numbers<[1], [0], [0], [1], [0, 0, 1, 1], [], []>} : vector<17x8xf32>, vector<8x32xf32>, vector<17x32xf32> -> vector<17x32xf32>
    %64 = arith.addf %45, %63 : vector<17x32xf32>
    %65 = vector.extract_strided_slice %40 {offsets = [0, 8], sizes = [17, 8], strides = [1, 1]} : vector<17x32xf32> to vector<17x8xf32>
    %66 = vector.extract_strided_slice %41 {offsets = [0, 8], sizes = [17, 8], strides = [1, 1]} : vector<17x32xf32> to vector<17x8xf32>
    %67 = tpu.transpose %66, [1, 0] : vector<17x8xf32> -> vector<8x17xf32>
    %cst_29 = arith.constant dense<0.000000e+00> : vector<17x17xf32>
    %68 = tpu.matmul %65, %67, %cst_29 {dimension_numbers = #tpu.dot_dimension_numbers<[1], [0], [0], [1], [0, 0, 1, 1], [], []>} : vector<17x8xf32>, vector<8x17xf32>, vector<17x17xf32> -> vector<17x17xf32>
    %cst_30 = arith.constant dense<0xFF800000> : vector<17xf32>
    %69 = vector.multi_reduction <maximumf>, %68, %cst_30 [1] : vector<17x17xf32> to vector<17xf32>
    %70 = vector.shape_cast %69 : vector<17xf32> to vector<17x1xf32>
    %71 = vector.broadcast %70 : vector<17x1xf32> to vector<17x17xf32>
    %72 = arith.subf %68, %71 : vector<17x17xf32>
    %73 = math.exp %72 : vector<17x17xf32>
    %cst_31 = arith.constant dense<0.000000e+00> : vector<17xf32>
    %74 = vector.multi_reduction <add>, %73, %cst_31 [1] : vector<17x17xf32> to vector<17xf32>
    %75 = vector.shape_cast %74 : vector<17xf32> to vector<17x1xf32>
    %76 = tpu.reciprocal %75 {approx = true} : vector<17x1xf32> -> vector<17x1xf32>
    %77 = vector.broadcast %76 : vector<17x1xf32> to vector<17x17xf32>
    %78 = arith.mulf %73, %77 : vector<17x17xf32>
    %79 = vector.extract_strided_slice %42 {offsets = [0, 8], sizes = [17, 8], strides = [1, 1]} : vector<17x32xf32> to vector<17x8xf32>
    %cst_32 = arith.constant dense<0.000000e+00> : vector<17x8xf32>
    %80 = tpu.matmul %78, %79, %cst_32 {dimension_numbers = #tpu.dot_dimension_numbers<[1], [0], [0], [1], [0, 0, 1, 1], [], []>} : vector<17x17xf32>, vector<17x8xf32>, vector<17x8xf32> -> vector<17x8xf32>
    %81 = vector.extract_strided_slice %44 {offsets = [8, 0], sizes = [8, 32], strides = [1, 1]} : vector<32x32xf32> to vector<8x32xf32>
    %cst_33 = arith.constant dense<0.000000e+00> : vector<17x32xf32>
    %82 = tpu.matmul %80, %81, %cst_33 {dimension_numbers = #tpu.dot_dimension_numbers<[1], [0], [0], [1], [0, 0, 1, 1], [], []>} : vector<17x8xf32>, vector<8x32xf32>, vector<17x32xf32> -> vector<17x32xf32>
    %83 = arith.addf %64, %82 : vector<17x32xf32>
    %84 = vector.extract_strided_slice %40 {offsets = [0, 16], sizes = [17, 8], strides = [1, 1]} : vector<17x32xf32> to vector<17x8xf32>
    %85 = vector.extract_strided_slice %41 {offsets = [0, 16], sizes = [17, 8], strides = [1, 1]} : vector<17x32xf32> to vector<17x8xf32>
    %86 = tpu.transpose %85, [1, 0] : vector<17x8xf32> -> vector<8x17xf32>
    %cst_34 = arith.constant dense<0.000000e+00> : vector<17x17xf32>
    %87 = tpu.matmul %84, %86, %cst_34 {dimension_numbers = #tpu.dot_dimension_numbers<[1], [0], [0], [1], [0, 0, 1, 1], [], []>} : vector<17x8xf32>, vector<8x17xf32>, vector<17x17xf32> -> vector<17x17xf32>
    %cst_35 = arith.constant dense<0xFF800000> : vector<17xf32>
    %88 = vector.multi_reduction <maximumf>, %87, %cst_35 [1] : vector<17x17xf32> to vector<17xf32>
    %89 = vector.shape_cast %88 : vector<17xf32> to vector<17x1xf32>
    %90 = vector.broadcast %89 : vector<17x1xf32> to vector<17x17xf32>
    %91 = arith.subf %87, %90 : vector<17x17xf32>
    %92 = math.exp %91 : vector<17x17xf32>
    %cst_36 = arith.constant dense<0.000000e+00> : vector<17xf32>
    %93 = vector.multi_reduction <add>, %92, %cst_36 [1] : vector<17x17xf32> to vector<17xf32>
    %94 = vector.shape_cast %93 : vector<17xf32> to vector<17x1xf32>
    %95 = tpu.reciprocal %94 {approx = true} : vector<17x1xf32> -> vector<17x1xf32>
    %96 = vector.broadcast %95 : vector<17x1xf32> to vector<17x17xf32>
    %97 = arith.mulf %92, %96 : vector<17x17xf32>
    %98 = vector.extract_strided_slice %42 {offsets = [0, 16], sizes = [17, 8], strides = [1, 1]} : vector<17x32xf32> to vector<17x8xf32>
    %cst_37 = arith.constant dense<0.000000e+00> : vector<17x8xf32>
    %99 = tpu.matmul %97, %98, %cst_37 {dimension_numbers = #tpu.dot_dimension_numbers<[1], [0], [0], [1], [0, 0, 1, 1], [], []>} : vector<17x17xf32>, vector<17x8xf32>, vector<17x8xf32> -> vector<17x8xf32>
    %100 = vector.extract_strided_slice %44 {offsets = [16, 0], sizes = [8, 32], strides = [1, 1]} : vector<32x32xf32> to vector<8x32xf32>
    %cst_38 = arith.constant dense<0.000000e+00> : vector<17x32xf32>
    %101 = tpu.matmul %99, %100, %cst_38 {dimension_numbers = #tpu.dot_dimension_numbers<[1], [0], [0], [1], [0, 0, 1, 1], [], []>} : vector<17x8xf32>, vector<8x32xf32>, vector<17x32xf32> -> vector<17x32xf32>
    %102 = arith.addf %83, %101 : vector<17x32xf32>
    %103 = vector.extract_strided_slice %40 {offsets = [0, 24], sizes = [17, 8], strides = [1, 1]} : vector<17x32xf32> to vector<17x8xf32>
    %104 = vector.extract_strided_slice %41 {offsets = [0, 24], sizes = [17, 8], strides = [1, 1]} : vector<17x32xf32> to vector<17x8xf32>
    %105 = tpu.transpose %104, [1, 0] : vector<17x8xf32> -> vector<8x17xf32>
    %cst_39 = arith.constant dense<0.000000e+00> : vector<17x17xf32>
    %106 = tpu.matmul %103, %105, %cst_39 {dimension_numbers = #tpu.dot_dimension_numbers<[1], [0], [0], [1], [0, 0, 1, 1], [], []>} : vector<17x8xf32>, vector<8x17xf32>, vector<17x17xf32> -> vector<17x17xf32>
    %cst_40 = arith.constant dense<0xFF800000> : vector<17xf32>
    %107 = vector.multi_reduction <maximumf>, %106, %cst_40 [1] : vector<17x17xf32> to vector<17xf32>
    %108 = vector.shape_cast %107 : vector<17xf32> to vector<17x1xf32>
    %109 = vector.broadcast %108 : vector<17x1xf32> to vector<17x17xf32>
    %110 = arith.subf %106, %109 : vector<17x17xf32>
    %111 = math.exp %110 : vector<17x17xf32>
    %cst_41 = arith.constant dense<0.000000e+00> : vector<17xf32>
    %112 = vector.multi_reduction <add>, %111, %cst_41 [1] : vector<17x17xf32> to vector<17xf32>
    %113 = vector.shape_cast %112 : vector<17xf32> to vector<17x1xf32>
    %114 = tpu.reciprocal %113 {approx = true} : vector<17x1xf32> -> vector<17x1xf32>
    %115 = vector.broadcast %114 : vector<17x1xf32> to vector<17x17xf32>
    %116 = arith.mulf %111, %115 : vector<17x17xf32>
    %117 = vector.extract_strided_slice %42 {offsets = [0, 24], sizes = [17, 8], strides = [1, 1]} : vector<17x32xf32> to vector<17x8xf32>
    %cst_42 = arith.constant dense<0.000000e+00> : vector<17x8xf32>
    %118 = tpu.matmul %116, %117, %cst_42 {dimension_numbers = #tpu.dot_dimension_numbers<[1], [0], [0], [1], [0, 0, 1, 1], [], []>} : vector<17x17xf32>, vector<17x8xf32>, vector<17x8xf32> -> vector<17x8xf32>
    %119 = vector.extract_strided_slice %44 {offsets = [24, 0], sizes = [8, 32], strides = [1, 1]} : vector<32x32xf32> to vector<8x32xf32>
    %cst_43 = arith.constant dense<0.000000e+00> : vector<17x32xf32>
    %120 = tpu.matmul %118, %119, %cst_43 {dimension_numbers = #tpu.dot_dimension_numbers<[1], [0], [0], [1], [0, 0, 1, 1], [], []>} : vector<17x8xf32>, vector<8x32xf32>, vector<17x32xf32> -> vector<17x32xf32>
    %121 = arith.addf %102, %120 : vector<17x32xf32>
    %122 = arith.addf %3, %121 : vector<17x32xf32>
    %c0_44 = arith.constant 0 : index
    %c0_45 = arith.constant 0 : index
    %c0_46 = arith.constant 0 : index
    %123 = vector.load %arg12[%c0_44, %c0_45, %c0_46] : memref<1x1x32xf32, #tpu.memory_space<vmem>>, vector<1x1x32xf32>
    %124 = vector.shape_cast %123 : vector<1x1x32xf32> to vector<1x32xf32>
    %125 = vector.broadcast %124 : vector<1x32xf32> to vector<17x32xf32>
    %126 = arith.addf %122, %125 : vector<17x32xf32>
    %c0_47 = arith.constant 0 : index
    %c0_48 = arith.constant 0 : index
    %c0_49 = arith.constant 0 : index
    %127 = vector.load %arg13[%c0_47, %c0_48, %c0_49] : memref<1x1x32xf32, #tpu.memory_space<vmem>>, vector<1x1x32xf32>
    %128 = vector.shape_cast %127 : vector<1x1x32xf32> to vector<1x32xf32>
    %c0_50 = arith.constant 0 : index
    %c0_51 = arith.constant 0 : index
    %c0_52 = arith.constant 0 : index
    %129 = vector.load %arg14[%c0_50, %c0_51, %c0_52] : memref<1x1x32xf32, #tpu.memory_space<vmem>>, vector<1x1x32xf32>
    %130 = vector.shape_cast %129 : vector<1x1x32xf32> to vector<1x32xf32>
    %cst_53 = arith.constant dense<0.000000e+00> : vector<17xf32>
    %131 = vector.multi_reduction <add>, %126, %cst_53 [1] : vector<17x32xf32> to vector<17xf32>
    %132 = vector.shape_cast %131 : vector<17xf32> to vector<17x1xf32>
    %cst_54 = arith.constant 3.200000e+01 : f32
    %133 = vector.broadcast %cst_54 : f32 to vector<17x1xf32>
    %134 = arith.divf %132, %133 : vector<17x1xf32>
    %135 = vector.broadcast %134 : vector<17x1xf32> to vector<17x32xf32>
    %136 = arith.subf %126, %135 : vector<17x32xf32>
    %137 = arith.mulf %136, %136 : vector<17x32xf32>
    %cst_55 = arith.constant dense<0.000000e+00> : vector<17xf32>
    %138 = vector.multi_reduction <add>, %137, %cst_55 [1] : vector<17x32xf32> to vector<17xf32>
    %139 = vector.shape_cast %138 : vector<17xf32> to vector<17x1xf32>
    %cst_56 = arith.constant 3.200000e+01 : f32
    %140 = vector.broadcast %cst_56 : f32 to vector<17x1xf32>
    %141 = arith.divf %139, %140 : vector<17x1xf32>
    %142 = vector.broadcast %134 : vector<17x1xf32> to vector<17x32xf32>
    %143 = arith.subf %126, %142 : vector<17x32xf32>
    %cst_57 = arith.constant 9.99999974E-6 : f32
    %144 = vector.broadcast %cst_57 : f32 to vector<17x1xf32>
    %145 = arith.addf %141, %144 : vector<17x1xf32>
    %146 = math.rsqrt %145 : vector<17x1xf32>
    %147 = vector.broadcast %146 : vector<17x1xf32> to vector<17x32xf32>
    %148 = arith.mulf %143, %147 : vector<17x32xf32>
    %149 = vector.broadcast %128 : vector<1x32xf32> to vector<17x32xf32>
    %150 = arith.mulf %148, %149 : vector<17x32xf32>
    %151 = vector.broadcast %130 : vector<1x32xf32> to vector<17x32xf32>
    %152 = arith.addf %150, %151 : vector<17x32xf32>
    %153 = arith.truncf %152 : vector<17x32xf32> to vector<17x32xbf16>
    %c0_58 = arith.constant 0 : index
    %c0_59 = arith.constant 0 : index
    %c0_60 = arith.constant 0 : index
    %154 = vector.load %arg15[%c0_58, %c0_59, %c0_60] : memref<1x32x128xbf16, #tpu.memory_space<vmem>>, vector<1x32x128xbf16>
    %155 = vector.shape_cast %154 : vector<1x32x128xbf16> to vector<32x128xbf16>
    %cst_61 = arith.constant dense<0.000000e+00> : vector<17x128xf32>
    %156 = tpu.matmul %153, %155, %cst_61 {dimension_numbers = #tpu.dot_dimension_numbers<[1], [0], [0], [1], [0, 0, 1, 1], [], []>} : vector<17x32xbf16>, vector<32x128xbf16>, vector<17x128xf32> -> vector<17x128xf32>
    %c0_62 = arith.constant 0 : index
    %c0_63 = arith.constant 0 : index
    %c0_64 = arith.constant 0 : index
    %157 = vector.load %arg16[%c0_62, %c0_63, %c0_64] : memref<1x1x128xf32, #tpu.memory_space<vmem>>, vector<1x1x128xf32>
    %158 = vector.shape_cast %157 : vector<1x1x128xf32> to vector<1x128xf32>
    %159 = vector.broadcast %158 : vector<1x128xf32> to vector<17x128xf32>
    %160 = arith.addf %156, %159 : vector<17x128xf32>
    %161 = arith.mulf %160, %160 : vector<17x128xf32>
    %162 = arith.mulf %160, %161 : vector<17x128xf32>
    %cst_65 = arith.constant 4.471500e-02 : f32
    %163 = vector.broadcast %cst_65 : f32 to vector<17x128xf32>
    %164 = arith.mulf %163, %162 : vector<17x128xf32>
    %165 = arith.addf %160, %164 : vector<17x128xf32>
    %cst_66 = arith.constant 0.797884583 : f32
    %166 = vector.broadcast %cst_66 : f32 to vector<17x128xf32>
    %167 = arith.mulf %166, %165 : vector<17x128xf32>
    %168 = math.tanh %167 : vector<17x128xf32>
    %cst_67 = arith.constant 1.000000e+00 : f32
    %169 = vector.broadcast %cst_67 : f32 to vector<17x128xf32>
    %170 = arith.addf %169, %168 : vector<17x128xf32>
    %cst_68 = arith.constant 5.000000e-01 : f32
    %171 = vector.broadcast %cst_68 : f32 to vector<17x128xf32>
    %172 = arith.mulf %171, %170 : vector<17x128xf32>
    %173 = arith.mulf %160, %172 : vector<17x128xf32>
    %174 = arith.truncf %173 : vector<17x128xf32> to vector<17x128xbf16>
    %c0_69 = arith.constant 0 : index
    %c0_70 = arith.constant 0 : index
    %c0_71 = arith.constant 0 : index
    %175 = vector.load %arg17[%c0_69, %c0_70, %c0_71] : memref<1x128x32xbf16, #tpu.memory_space<vmem>>, vector<1x128x32xbf16>
    %176 = vector.shape_cast %175 : vector<1x128x32xbf16> to vector<128x32xbf16>
    %cst_72 = arith.constant dense<0.000000e+00> : vector<17x32xf32>
    %177 = tpu.matmul %174, %176, %cst_72 {dimension_numbers = #tpu.dot_dimension_numbers<[1], [0], [0], [1], [0, 0, 1, 1], [], []>} : vector<17x128xbf16>, vector<128x32xbf16>, vector<17x32xf32> -> vector<17x32xf32>
    %c0_73 = arith.constant 0 : index
    %c0_74 = arith.constant 0 : index
    %c0_75 = arith.constant 0 : index
    %178 = vector.load %arg18[%c0_73, %c0_74, %c0_75] : memref<1x1x32xf32, #tpu.memory_space<vmem>>, vector<1x1x32xf32>
    %179 = vector.shape_cast %178 : vector<1x1x32xf32> to vector<1x32xf32>
    %180 = vector.broadcast %179 : vector<1x32xf32> to vector<17x32xf32>
    %181 = arith.addf %177, %180 : vector<17x32xf32>
    %182 = arith.addf %126, %181 : vector<17x32xf32>
    %c0_76 = arith.constant 0 : index
    %c0_77 = arith.constant 0 : index
    %183 = vector.load %arg24[%c0_76, %c0_77] : memref<17x32xf32, #tpu.memory_space<vmem>>, vector<17x32xf32>
    tpu.vector_store %arg24[%c0_76, %c0_77], %182 {strides = array<i32>} : memref<17x32xf32, #tpu.memory_space<vmem>>, vector<17x32xf32>,
    %c1_i32 = arith.constant 1 : i32
    %184 = arith.cmpi eq, %arg1, %c1_i32 : i32
    %185 = arith.extui %184 : i1 to i32
    %c0_i32_78 = arith.constant 0 : i32
    %186 = arith.cmpi ne, %185, %c0_i32_78 : i32
    scf.if %186 {
      %c0_79 = arith.constant 0 : index
      %c0_80 = arith.constant 0 : index
      %187 = vector.load %arg19[%c0_79, %c0_80] : memref<1x32xf32, #tpu.memory_space<vmem>>, vector<1x32xf32>
      %c0_81 = arith.constant 0 : index
      %c0_82 = arith.constant 0 : index
      %188 = vector.load %arg20[%c0_81, %c0_82] : memref<1x32xf32, #tpu.memory_space<vmem>>, vector<1x32xf32>
      %cst_83 = arith.constant dense<0.000000e+00> : vector<17xf32>
      %189 = vector.multi_reduction <add>, %182, %cst_83 [1] : vector<17x32xf32> to vector<17xf32>
      %190 = vector.shape_cast %189 : vector<17xf32> to vector<17x1xf32>
      %cst_84 = arith.constant 3.200000e+01 : f32
      %191 = vector.broadcast %cst_84 : f32 to vector<17x1xf32>
      %192 = arith.divf %190, %191 : vector<17x1xf32>
      %193 = vector.broadcast %192 : vector<17x1xf32> to vector<17x32xf32>
      %194 = arith.subf %182, %193 : vector<17x32xf32>
      %195 = arith.mulf %194, %194 : vector<17x32xf32>
      %cst_85 = arith.constant dense<0.000000e+00> : vector<17xf32>
      %196 = vector.multi_reduction <add>, %195, %cst_85 [1] : vector<17x32xf32> to vector<17xf32>
      %197 = vector.shape_cast %196 : vector<17xf32> to vector<17x1xf32>
      %cst_86 = arith.constant 3.200000e+01 : f32
      %198 = vector.broadcast %cst_86 : f32 to vector<17x1xf32>
      %199 = arith.divf %197, %198 : vector<17x1xf32>
      %200 = vector.broadcast %192 : vector<17x1xf32> to vector<17x32xf32>
      %201 = arith.subf %182, %200 : vector<17x32xf32>
      %cst_87 = arith.constant 9.99999974E-6 : f32
      %202 = vector.broadcast %cst_87 : f32 to vector<17x1xf32>
      %203 = arith.addf %199, %202 : vector<17x1xf32>
      %204 = math.rsqrt %203 : vector<17x1xf32>
      %205 = vector.broadcast %204 : vector<17x1xf32> to vector<17x32xf32>
      %206 = arith.mulf %201, %205 : vector<17x32xf32>
      %207 = vector.broadcast %187 : vector<1x32xf32> to vector<17x32xf32>
      %208 = arith.mulf %206, %207 : vector<17x32xf32>
      %209 = vector.broadcast %188 : vector<1x32xf32> to vector<17x32xf32>
      %210 = arith.addf %208, %209 : vector<17x32xf32>
      %c0_88 = arith.constant 0 : index
      %c0_89 = arith.constant 0 : index
      %c0_90 = arith.constant 0 : index
      %211 = vector.load %arg22[%c0_88, %c0_89, %c0_90] : memref<1x17x32xf32, #tpu.memory_space<vmem>>, vector<1x17x32xf32>
      %212 = vector.shape_cast %211 : vector<1x17x32xf32> to vector<17x32xf32>
      %213 = vector.shape_cast %210 : vector<17x32xf32> to vector<1x17x32xf32>
      tpu.vector_store %arg22[%c0_88, %c0_89, %c0_90], %213 {strides = array<i32>} : memref<1x17x32xf32, #tpu.memory_space<vmem>>, vector<1x17x32xf32>,
      %214 = vector.extract_strided_slice %210 {offsets = [0, 0], sizes = [1, 32], strides = [1, 1]} : vector<17x32xf32> to vector<1x32xf32>
      %215 = arith.truncf %214 : vector<1x32xf32> to vector<1x32xbf16>
      %c0_91 = arith.constant 0 : index
      %c0_92 = arith.constant 0 : index
      %216 = vector.load %arg21[%c0_91, %c0_92] : memref<32x16xbf16, #tpu.memory_space<vmem>>, vector<32x16xbf16>
      %cst_93 = arith.constant dense<0.000000e+00> : vector<1x16xf32>
      %217 = tpu.matmul %215, %216, %cst_93 {dimension_numbers = #tpu.dot_dimension_numbers<[1], [0], [0], [1], [0, 0, 1, 1], [], []>} : vector<1x32xbf16>, vector<32x16xbf16>, vector<1x16xf32> -> vector<1x16xf32>
      %c0_94 = arith.constant 0 : index
      %c0_95 = arith.constant 0 : index
      %c0_96 = arith.constant 0 : index
      %218 = vector.load %arg23[%c0_94, %c0_95, %c0_96] : memref<1x1x16xf32, #tpu.memory_space<vmem>>, vector<1x1x16xf32>
      %219 = vector.shape_cast %218 : vector<1x1x16xf32> to vector<1x16xf32>
      %220 = vector.shape_cast %217 : vector<1x16xf32> to vector<1x1x16xf32>
      tpu.vector_store %arg23[%c0_94, %c0_95, %c0_96], %220 {strides = array<i32>} : memref<1x1x16xf32, #tpu.memory_space<vmem>>, vector<1x1x16xf32>,
    } else {
    }
    return
  }
  func.func @transform_0(%arg0: i32, %arg1: i32) -> (i32, i32, i32) {
    %c0_i32 = arith.constant 0 : i32
    %c0_i32_0 = arith.constant 0 : i32
    %c0_i32_1 = arith.constant 0 : i32
    return %arg0, %c0_i32, %c0_i32_0 : i32, i32, i32
  }
  func.func @transform_1(%arg0: i32, %arg1: i32) -> (i32, i32) {
    %c0_i32 = arith.constant 0 : i32
    %c0_i32_0 = arith.constant 0 : i32
    %c0_i32_1 = arith.constant 0 : i32
    return %c0_i32, %c0_i32_0 : i32, i32
  }
  func.func @transform_2(%arg0: i32, %arg1: i32) -> (i32, i32) {
    %c0_i32 = arith.constant 0 : i32
    %c0_i32_0 = arith.constant 0 : i32
    %c0_i32_1 = arith.constant 0 : i32
    return %c0_i32, %c0_i32_0 : i32, i32
  }
  func.func @transform_3(%arg0: i32, %arg1: i32) -> (i32, i32) {
    %c0_i32 = arith.constant 0 : i32
    %c0_i32_0 = arith.constant 0 : i32
    %c0_i32_1 = arith.constant 0 : i32
    return %c0_i32, %c0_i32_0 : i32, i32
  }
  func.func @transform_4(%arg0: i32, %arg1: i32) -> (i32, i32) {
    %c0_i32 = arith.constant 0 : i32
    %c0_i32_0 = arith.constant 0 : i32
    %c0_i32_1 = arith.constant 0 : i32
    return %c0_i32, %c0_i32_0 : i32, i32
  }
  func.func @transform_5(%arg0: i32, %arg1: i32) -> (i32, i32, i32) {
    %c0_i32 = arith.constant 0 : i32
    %c0_i32_0 = arith.constant 0 : i32
    %c0_i32_1 = arith.constant 0 : i32
    return %arg1, %c0_i32, %c0_i32_0 : i32, i32, i32
  }
  func.func @transform_6(%arg0: i32, %arg1: i32) -> (i32, i32, i32) {
    %c0_i32 = arith.constant 0 : i32
    %c0_i32_0 = arith.constant 0 : i32
    %c0_i32_1 = arith.constant 0 : i32
    return %arg1, %c0_i32, %c0_i32_0 : i32, i32, i32
  }
  func.func @transform_7(%arg0: i32, %arg1: i32) -> (i32, i32, i32) {
    %c0_i32 = arith.constant 0 : i32
    %c0_i32_0 = arith.constant 0 : i32
    %c0_i32_1 = arith.constant 0 : i32
    return %arg1, %c0_i32, %c0_i32_0 : i32, i32, i32
  }
  func.func @transform_8(%arg0: i32, %arg1: i32) -> (i32, i32, i32) {
    %c0_i32 = arith.constant 0 : i32
    %c0_i32_0 = arith.constant 0 : i32
    %c0_i32_1 = arith.constant 0 : i32
    return %arg1, %c0_i32, %c0_i32_0 : i32, i32, i32
  }
  func.func @transform_9(%arg0: i32, %arg1: i32) -> (i32, i32, i32) {
    %c0_i32 = arith.constant 0 : i32
    %c0_i32_0 = arith.constant 0 : i32
    %c0_i32_1 = arith.constant 0 : i32
    return %arg1, %c0_i32, %c0_i32_0 : i32, i32, i32
  }
  func.func @transform_10(%arg0: i32, %arg1: i32) -> (i32, i32, i32) {
    %c0_i32 = arith.constant 0 : i32
    %c0_i32_0 = arith.constant 0 : i32
    %c0_i32_1 = arith.constant 0 : i32
    return %arg1, %c0_i32, %c0_i32_0 : i32, i32, i32
  }
  func.func @transform_11(%arg0: i32, %arg1: i32) -> (i32, i32, i32) {
    %c0_i32 = arith.constant 0 : i32
    %c0_i32_0 = arith.constant 0 : i32
    %c0_i32_1 = arith.constant 0 : i32
    return %arg1, %c0_i32, %c0_i32_0 : i32, i32, i32
  }
  func.func @transform_12(%arg0: i32, %arg1: i32) -> (i32, i32, i32) {
    %c0_i32 = arith.constant 0 : i32
    %c0_i32_0 = arith.constant 0 : i32
    %c0_i32_1 = arith.constant 0 : i32
    return %arg1, %c0_i32, %c0_i32_0 : i32, i32, i32
  }
  func.func @transform_13(%arg0: i32, %arg1: i32) -> (i32, i32, i32) {
    %c0_i32 = arith.constant 0 : i32
    %c0_i32_0 = arith.constant 0 : i32
    %c0_i32_1 = arith.constant 0 : i32
    return %arg1, %c0_i32, %c0_i32_0 : i32, i32, i32
  }
  func.func @transform_14(%arg0: i32, %arg1: i32) -> (i32, i32, i32) {
    %c0_i32 = arith.constant 0 : i32
    %c0_i32_0 = arith.constant 0 : i32
    %c0_i32_1 = arith.constant 0 : i32
    return %arg1, %c0_i32, %c0_i32_0 : i32, i32, i32
  }
  func.func @transform_15(%arg0: i32, %arg1: i32) -> (i32, i32, i32) {
    %c0_i32 = arith.constant 0 : i32
    %c0_i32_0 = arith.constant 0 : i32
    %c0_i32_1 = arith.constant 0 : i32
    return %arg1, %c0_i32, %c0_i32_0 : i32, i32, i32
  }
  func.func @transform_16(%arg0: i32, %arg1: i32) -> (i32, i32, i32) {
    %c0_i32 = arith.constant 0 : i32
    %c0_i32_0 = arith.constant 0 : i32
    %c0_i32_1 = arith.constant 0 : i32
    return %arg1, %c0_i32, %c0_i32_0 : i32, i32, i32
  }
  func.func @transform_17(%arg0: i32, %arg1: i32) -> (i32, i32) {
    %c0_i32 = arith.constant 0 : i32
    %c0_i32_0 = arith.constant 0 : i32
    %c0_i32_1 = arith.constant 0 : i32
    return %c0_i32, %c0_i32_0 : i32, i32
  }
  func.func @transform_18(%arg0: i32, %arg1: i32) -> (i32, i32) {
    %c0_i32 = arith.constant 0 : i32
    %c0_i32_0 = arith.constant 0 : i32
    %c0_i32_1 = arith.constant 0 : i32
    return %c0_i32, %c0_i32_0 : i32, i32
  }
  func.func @transform_19(%arg0: i32, %arg1: i32) -> (i32, i32) {
    %c0_i32 = arith.constant 0 : i32
    %c0_i32_0 = arith.constant 0 : i32
    %c0_i32_1 = arith.constant 0 : i32
    return %c0_i32, %c0_i32_0 : i32, i32
  }
  func.func @transform_20(%arg0: i32, %arg1: i32) -> (i32, i32, i32) {
    %c0_i32 = arith.constant 0 : i32
    %c0_i32_0 = arith.constant 0 : i32
    %c0_i32_1 = arith.constant 0 : i32
    return %arg0, %c0_i32, %c0_i32_0 : i32, i32, i32
  }
  func.func @transform_21(%arg0: i32, %arg1: i32) -> (i32, i32, i32) {
    %c0_i32 = arith.constant 0 : i32
    %c0_i32_0 = arith.constant 0 : i32
    %c0_i32_1 = arith.constant 0 : i32
    return %arg0, %c0_i32, %c0_i32_0 : i32, i32, i32
  }
}

</mosaic_0001>

<bundles_post_ra>
// kernel: image_encoder_forward.1
= control target key start
LH: loop header
LB: loop body
LE: loop exit
PB: predicated region body
PF: predicated region fallthrough
CT: control target
= control target key end

     0   :  { %s4753_s0 = inlined_call_operand.vmem [shape: bf16[2,17,64], index: 0, kind: input, shape index: {}]   ;;  %s4754_s1 = inlined_call_operand.vmem [shape: bf16[64,32], index: 1, kind: input, shape index: {}]   ;;  %s4755_s2 = inlined_call_operand.vmem [shape: f32[17,32], index: 2, kind: input, shape index: {}]   ;;  %s4756_s3 = inlined_call_operand.vmem [shape: f32[1,32], index: 3, kind: input, shape index: {}]   ;;  %s4757_s4 = inlined_call_operand.vmem [shape: f32[1,32], index: 4, kind: input, shape index: {}]   ;;  %s4758_s5 = inlined_call_operand.vmem [shape: f32[2,1,32], index: 5, kind: input, shape index: {}]   ;;  %s4759_s6 = inlined_call_operand.vmem [shape: f32[2,1,32], index: 6, kind: input, shape index: {}]   ;;  %s4760_s7 = inlined_call_operand.vmem [shape: bf16[2,32,96], index: 7, kind: input, shape index: {}]   ;;  %s4761_s8 = inlined_call_operand.vmem [shape: f32[2,1,96], index: 8, kind: input, shape index: {}]   ;;  %s4762_s9 = inlined_call_operand.vmem [shape: f32[2,32,32], index: 9, kind: input, shape index: {}]   ;;  %s4763_s10 = inlined_call_operand.vmem [shape: f32[2,1,32], index: 10, kind: input, shape index: {}]   ;;  %s4764_s11 = inlined_call_operand.vmem [shape: f32[2,1,32], index: 11, kind: input, shape index: {}]   ;;  %s4765_s12 = inlined_call_operand.vmem [shape: f32[2,1,32], index: 12, kind: input, shape index: {}]   ;;  %s4766_s13 = inlined_call_operand.vmem [shape: bf16[2,32,128], index: 13, kind: input, shape index: {}]   ;;  %s4767_s14 = inlined_call_operand.vmem [shape: f32[2,1,128], index: 14, kind: input, shape index: {}]   ;;  %s4768_s15 = inlined_call_operand.vmem [shape: bf16[2,128,32], index: 15, kind: input, shape index: {}]   ;;  %s4769_s16 = inlined_call_operand.vmem [shape: f32[2,1,32], index: 16, kind: input, shape index: {}]   ;;  %s4770_s17 = inlined_call_operand.vmem [shape: f32[1,32], index: 17, kind: input, shape index: {}]   ;;  %s4771_s18 = inlined_call_operand.vmem [shape: f32[1,32], index: 18, kind: input, shape index: {}]   ;;  %s4772_s19 = inlined_call_operand.vmem [shape: bf16[32,16], index: 19, kind: input, shape index: {}]   ;;  %s4773_s20 = inlined_call_operand.hbm [shape: f32[2,17,32], index: 20, kind: output, shape index: {0}]   ;;  %s4774_s21 = inlined_call_operand.hbm [shape: f32[2,1,16], index: 21, kind: output, shape index: {1}]  }
   0x1   :  { %4796 = sst [smem:[#allocation23_spill]] %s4753_s0 }
   0x2   :  { %4797 = sst [smem:[#allocation24_spill]] %s4754_s1 }
   0x3   :  { %4798 = sst [smem:[#allocation25_spill]] %s4755_s2 }
   0x4   :  { %4799 = sst [smem:[#allocation26_spill]] %s4756_s3 }
   0x5   :  { %4800 = sst [smem:[#allocation27_spill]] %s4757_s4 }
   0x6   :  { %4801 = sst [smem:[#allocation28_spill]] %s4758_s5 }
   0x7   :  { %4802 = sst [smem:[#allocation29_spill]] %s4759_s6 }
   0x8   :  { %4803 = sst [smem:[#allocation30_spill]] %s4760_s7 }
   0x9   :  { %4804 = sst [smem:[#allocation31_spill]] %s4761_s8 }
   0xa   :  { %4805 = sst [smem:[#allocation32_spill]] %s4762_s9 }
   0xb   :  { %4806 = sst [smem:[#allocation33_spill]] %s4770_s17 }
   0xc   :  { %4807 = sst [smem:[#allocation34_spill]] %s4771_s18 }
   0xd   :  { %4808 = sst [smem:[#allocation35_spill]] %s4772_s19 }
   0xe   :  { %4809 = sst [smem:[#allocation36_spill]] %s4773_s20 }
   0xf   :  { %4810 = sst [smem:[#allocation37_spill]] %s4774_s21 }
  0x10   :  { %27 = vsyncpa [#allocation4], 0 }
  0x11   :  { %29 = vsyncpa [#allocation4 + $0x1], 0 }
  0x12   :  { %30 = vsyncpa [#allocation6], 0 }
  0x13   :  { %32 = vsyncpa [#allocation6 + $0x1], 0  ;;  %s4136_s2 = smov 0   ;;  %s4138_s25 = smov 0  }
  0x14   :  { %s4140_s26 = smov 0   ;;  %s4142_s27 = smov 0  }
  0x15   :  { %s4144_s3 = smov 0   ;;  %s4146_s28 = smov 0  }
  0x16   :  { %s4148_s29 = smov 0   ;;  %s4150_s0 = smov 0  }
  0x17 LB: > { %4811 = sst [smem:[#allocation9_spill]] %s3976_s2  ;;  %s3186_s4 = sadd.s32 4294967295, %s4004_s0   ;;  %s4004_s0 = sphi %s4150_s0, %s38_s0   ;;  %s4000_s29 = sphi %s4148_s29, %s4873_s29   ;;  %s3996_s28 = sphi %s4146_s28, %s4872_s28   ;;  %s3992_s3 = sphi %s4144_s3, %s4871_s3   ;;  %s3988_s27 = sphi %s4142_s27, %s4870_s27   ;;  %s3984_s26 = sphi %s4140_s26, %s4869_s26   ;;  %s3980_s25 = sphi %s4138_s25, %s4868_s25   ;;  %s3976_s2 = sphi %s4136_s2, %s4867_s2  }
  0x18   : > { %4812 = sst [smem:[#allocation10_spill]] %s3980_s25  ;;  %s3187_s30 = sadd.s32 4294967294, %s4004_s0  }
  0x19   : > { %4813 = sst [smem:[#allocation11_spill]] %s3984_s26  ;;  %s47_s5 = sadd.s32 1, %s3996_s28 }
  0x1a   : > { %4814 = sst [smem:[#allocation12_spill]] %s3988_s27  ;;  %p48_p0 = scmp.ge.s32.totalorder %s47_s5, 2 }
  0x1b   : > { %4815 = sst [smem:[#allocation13_spill]] %s3992_s3  ;;  %s50_s22 = sadd.s32 1, %s4000_s29 }
  0x1c   : > { %4816 = sst [smem:[#allocation14_spill]] %s3996_s28  ;;  %p552_p1 = scmp.ne.s32.totalorder %s3984_s26, %s3980_s25 }
  0x1d   : > { %4817 = sst [smem:[#allocation15_spill]] %s4000_s29  ;;  %p553_p2 = scmp.eq.s32.totalorder %s3186_s4, 3 }
  0x1e   : > { %4818 = sst [smem:[#allocation16_spill]] %s4004_s0  ;;  %s4875_s5 = smov (%p48_p0, %s47_s5), 0 }
  0x1f   : > { %4819 = sst [smem:[#allocation17_spill]] %s4875_s5  ;;  %s4877_s22 = smov (!%p48_p0, %s50_s22), %s4000_s29 }
  0x20   : > { %p4185_p3 = por %p553_p2, %p552_p1  ;;  %p558_p4 = scmp.ne.s32.totalorder %s3980_s25, %s3976_s2 }
  0x21   : > { %p52_p5 = scmp.ge.s32.totalorder %s4877_s22, 2  ;;  %p559_p6 = scmp.eq.s32.totalorder %s3187_s30, 3 }
  0x22   : > { %s4820_s23 = scalar_select %p4185_p3, 1, 0 }
  0x23   : > { %p3190_p7 = scmp.ge.s32.totalorder %s4004_s0, 1  ;;  %p712_p8 = scmp.lt.s32.totalorder %s4004_s0, 5 }
  0x24   : > { %4821 = sst [smem:[#allocation18_spill]] %s4820_s23  ;;  %s4879_s22 = smov (%p52_p5, %s4877_s22), 0 }
  0x25   : > { %4822 = sst [smem:[#allocation19_spill]] %s4879_s22  ;;  %p4195_p9 = por %p559_p6, %p558_p4 }
  0x26   : > { %p713_p10 = pnand %p3190_p7, %p712_p8  ;;  %s539_s24 = ssub.s32 %s4000_s29, %s4879_s22 }
  0x27   : > { %s4823_s1 = scalar_select %p4195_p9, 1, 0 }
  0x28   : > { %s542_s4 = sadd.s32 1, %s3984_s26  ;;  %p540_p11 = scmp.eq.s32.totalorder %s539_s24, 0 }
  0x29   : > { %4824 = sst [smem:[#allocation20_spill]] %s4823_s1  ;;  %716 = sbr.rel (%p713_p10) target bundleno = 5512 (0x1588), region = 100 }
  0x2a   : > { %s4203_s5 = scalar_select %p540_p11, %s3984_s26, %s542_s4  }
  0x2c   : > { %4825 = sst [smem:[#allocation21_spill]] %s4203_s5 }
  0x30   : > { %s4206_s30 = sand.u32 1, %s3980_s25   ;;  %p820_p12 = scmp.lt.s32.totalorder %s3992_s3, 1 }
  0x31   : > { %s3640_s28 = smul.u32 24, %s4206_s30  ;;  %p825_p13 = scmp.lt.s32.totalorder %s3988_s27, 1 }
  0x32   : > { %s821_s2 = scalar_select %p820_p12, %s3992_s3, 1 }
  0x33   : > { %s4213_s0 = scalar_select %p825_p13, %s3988_s27, 1 }
  0x34   : > { %s3641_s1 = smul.u32 12, %s821_s2  ;;  %s4826_s4 = sld [smem:[#allocation23_spill]] }
  0x35   : > { %s3297_s24 = sshll.u32 %s4213_s0, 4  ;;  %s4831_s7 = sld [smem:[#allocation30_spill]] }
  0x36   : > { %s4832_s9 = sld [smem:[#allocation32_spill]]  ;;  %s868_s21 = scalar_lea.vmem %s4769_s16, %s4213_s0 }
  0x37   : > { %s4275_s18 = scalar_lea.vmem [#allocation3], %s3640_s28  ;;  %s819_s23 = scalar_lea.vmem [#allocation5], %s4206_s30 }
  0x38   : > { %s4833_s25 = sld [smem:[#allocation12_spill]] }
  0x3a   : > { %s4218_s29 = scalar_lea.vmem %s4826_s4, %s3641_s1  ;;  %s3298_s1 = sshll.u32 %s4213_s0, 5 }
  0x3b   : > { %4827 = sst [smem:[#allocation22_spill]] %s4218_s29  ;;  %s4236_s27 = scalar_lea.vmem %s4831_s7, %s3297_s24 }
  0x3c   : > { %s4242_s26 = scalar_lea.vmem %s4832_s9, %s3298_s1  ;;  %s4259_s7 = scalar_lea.vmem %s4766_s13, %s3297_s24 }
  0x3d   : > { %s3300_s9 = sshll.u32 %s4213_s0, 6 }
  0x3e   : > { %s4273_s3 = scalar_lea.vmem %s4768_s15, %s3300_s9  ;;  %p3200_p0 = scmp.ne.s32.totalorder %s4833_s25, 0 }
  0x3f   : > { %s4834_s29 = sld [smem:[#allocation24_spill]] (!%p3200_p0)  ;;  %s4836_s4 = sld [smem:[#allocation22_spill]] (!%p3200_p0)  ;;  %vm920_vm0 = vcmask (!%p3200_p0), 523264   ;;  %vm984_vm1 = vcmask (!%p3200_p0), 253952   ;;  %vm977_vm2 = vcmask (!%p3200_p0), 261120  }
  0x40   : > { %873 = sbr.rel (%p3200_p0) target bundleno = 620 (0x26c), region = 104  ;;  %s4837_s25 = sld [smem:[#allocation25_spill]] (!%p3200_p0) }
  0x41   : > { %s4839_s28 = sld [smem:[#allocation26_spill]] (!%p3200_p0)  ;;  %s4840_s2 = sld [smem:[#allocation27_spill]] (!%p3200_p0) }
  0x45   : > { %s4835_s1 = smov (!%p3200_p0), %s4834_s29  ;;  %v3737_v0 = vld [vmem:[%s4834_s29] sm:$0xff] (!%p3200_p0)   ;;  %v3742_v5 = vld [vmem:[%s4836_s4 + $0x8] ss:$0 sps:$4 sm:$0x11] (!%p3200_p0)  }
  0x46   : > { %v3738_v1 = vld [vmem:[%s4835_s1 + $0x8] sm:$0xff] (!%p3200_p0)   ;;  %3392 = vmatprep.subr.bf16.mxu0 (!%p3200_p0), %v3737_v0  ;;  %v3739_v2 = vld [vmem:[%s4835_s1 + $0x10] sm:$0xff] (!%p3200_p0)   ;;  %v3741_v3 = vld [vmem:[%s4836_s4] sm:$0xff] (!%p3200_p0)   ;;  %s4838_s24 = smov (!%p3200_p0), %s4837_s25 }
  0x47   : > { %3393 = vmatpush3.bf16.msra.mxu0 %v3737_v0  ;;  %3400 = vmatprep.mubr.msk.bf16.mxu0 %vm920_vm0, %v3741_v3  ;;  %v3740_v4 = vld [vmem:[%s4835_s1 + $0x18] sm:$0xff]   ;;  %v887_v6 = vld [vmem:[%s4837_s25 + $0x10] sm:$0x1]  ;;  %v885_v7 = vld [vmem:[%s4838_s24] sm:$0xff] }
  0x48   : > { %3394 = vmatprep.subr.bf16.mxu0 %v3738_v1  ;;  %v886_v11 = vld [vmem:[%s4838_s24 + $0x8] sm:$0xff]  ;;  %v3209_v44 = vld [vmem:[%s4839_s28] ss:$0 sm:$0xff] }
  0x49   : > { %v3210_v46 = vld [vmem:[%s4840_s2] ss:$0 sm:$0xff] }
  0x4b   : > { %3395 = vmatpush3.bf16.msra.mxu0 %v3738_v1 }
  0x4c   : > { %3396 = vmatprep.subr.bf16.mxu0 %v3739_v2 }
  0x4f   : > { %3397 = vmatpush3.bf16.msra.mxu0 %v3739_v2 }
  0x50   : > { %3398 = vmatprep.subr.bf16.mxu0 %v3740_v4 }
  0x53   : > { %3399 = vmatpush3.bf16.msra.mxu0 %v3740_v4 }
  0x56   : > { %3401 = vmatmul.mubr.msk.bf16.vlgmr.msra.gmra.mrb[0].mxu0 %vm920_vm0, %v3742_v5 }
 0x129   : > { %v3402_v8 = vpop.f32.mrb[0].mxu0 }
 0x12a   : > { %v970_v9 = vadd.f32 %v3402_v8, %v887_v6  ;;  %v961_v10 = vpop.f32.mrb[1].mxu0 }
 0x12b   : > { %v962_v12 = vadd.f32 %v961_v10, %v885_v7  ;;  %v3403_v13 = vpop.f32.mrb[2].mxu0 }
 0x12c   : > { %v964_v14 = vpop.f32.mrb[3].mxu0  ;;  %v985_v15 = vsel %vm984_vm1, %v970_v9, 0.0 }
 0x12d   : > { %v965_v16 = vadd.f32 %v964_v14, %v886_v11  ;;  %986 = vadd.xlane.f32.xlu1 %v985_v15  ;;  %v978_v17 = vsel %vm977_vm2, %v962_v12, 0.0 }
 0x12e   : > { %979 = vadd.xlane.f32.xlu0 %v978_v17 }
 0x12f   : > { %v981_v18 = vsel %vm977_vm2, %v965_v16, 0.0 }
 0x132   : > { %982 = vadd.xlane.f32.xlu0 %v981_v18 }
 0x1ba   : > { %v987_v19 = vpop.xlane.xlu1 %986 }
 0x1bb   : > { %v991_v20 = vmul.f32 0.03125, %v987_v19  ;;  %v980_v21 = vpop.xlane.xlu0 %979 }
 0x1bc   : > { %v989_v22 = vmul.f32 0.03125, %v980_v21 }
 0x1bd   : > { %v994_v23 = vsub.f32 %v970_v9, %v991_v20 }
 0x1be   : > { %v992_v24 = vsub.f32 %v962_v12, %v989_v22 }
 0x1bf   : > { %v983_v25 = vpop.xlane.xlu0 %982  ;;  %v997_v30 = vmul.f32 %v994_v23, %v994_v23 }
 0x1c0   : > { %v990_v26 = vmul.f32 0.03125, %v983_v25  ;;  %v995_v27 = vmul.f32 %v992_v24, %v992_v24 }
 0x1c1   : > { %v1004_v32 = vsel %vm984_vm1, %v997_v30, 0.0 }
 0x1c2   : > { %v993_v28 = vsub.f32 %v965_v16, %v990_v26  ;;  %v998_v29 = vsel %vm977_vm2, %v995_v27, 0.0 }
 0x1c3   : > { %999 = vadd.xlane.f32.xlu1 %v998_v29 }
 0x1c4   : > { %v996_v31 = vmul.f32 %v993_v28, %v993_v28 }
 0x1c6   : > { %v1001_v33 = vsel %vm977_vm2, %v996_v31, 0.0 }
 0x1c7   : > { %1005 = vadd.xlane.f32.xlu1 %v1004_v32  ;;  %1002 = vadd.xlane.f32.xlu0 %v1001_v33 }
 0x250   : > { %v1000_v34 = vpop.xlane.xlu1 %999 }
 0x251   : > { %v1007_v35 = vmul.f32 0.03125, %v1000_v34 }
 0x253   : > { %v1010_v36 = vadd.f32 1e-05, %v1007_v35 }
 0x254   : > { %v1006_v37 = vpop.xlane.xlu1 %1005  ;;  %v1003_v38 = vpop.xlane.xlu0 %1002 }
 0x255   : > { %3743 = vrsqrt.f32 %v1010_v36  ;;  %v1009_v39 = vmul.f32 0.03125, %v1006_v37  ;;  %v1008_v40 = vmul.f32 0.03125, %v1003_v38 }
 0x257   : > { %v1012_v41 = vadd.f32 1e-05, %v1009_v39  ;;  %v1011_v42 = vadd.f32 1e-05, %v1008_v40 }
 0x259   : > { %3745 = vrsqrt.f32 %v1012_v41 }
 0x25a   : > { %3747 = vrsqrt.f32 %v1011_v42 }
 0x25f   : > { %v3744_v43 = vpop.eup %3743 }
 0x260   : > { %v1016_v45 = vmul.f32 %v3744_v43, %v992_v24 }
 0x262   : > { %v1025_v47 = vmul.f32 %v3209_v44, %v1016_v45 }
 0x263   : > { %v3746_v48 = vpop.eup %3745 }
 0x264   : > { %v3748_v49 = vpop.eup %3747  ;;  %v1034_v50 = vadd.f32 %v3210_v46, %v1025_v47  ;;  %v1018_v51 = vmul.f32 %v3746_v48, %v994_v23 }
 0x265   : > { %v1017_v52 = vmul.f32 %v3748_v49, %v993_v28 }
 0x266   : > { %1037 = vst.msk [vmem:[#allocation2] sm:$0xff] %vm977_vm2, %v1034_v50  ;;  %v1027_v53 = vmul.f32 %v3209_v44, %v1018_v51 }
 0x267   : > { %v1026_v54 = vmul.f32 %v3209_v44, %v1017_v52 }
 0x268   : > { %v1036_v55 = vadd.f32 %v3210_v46, %v1027_v53 }
 0x269   : > { %v1035_v56 = vadd.f32 %v3210_v46, %v1026_v54 }
 0x26a   : > { %1039 = vst.msk [vmem:[#allocation2 + $0x10] sm:$0x1] %vm984_vm1, %v1036_v55 }
 0x26b   : > { %1038 = vst.msk [vmem:[#allocation2 + $0x8] sm:$0xff] %vm977_vm2, %v1035_v56 }
 0x26c PF: > { %vm1045_vm3 = vcmask 261120   ;;  %vm1052_vm4 = vcmask 253952   ;;  %v3789_v14 = vld [vmem:[%s4236_s27] sm:$0xff]   ;;  %v3790_v15 = vld [vmem:[%s4236_s27 + $0x8] sm:$0xff]   ;;  %s4841_s19 = sld [smem:[#allocation28_spill]]  ;;  %s4843_s6 = sld [smem:[#allocation29_spill]] }
 0x26d   : > { %v1040_v57 = vld [vmem:[#allocation2] sm:$0xff]  ;;  %3404 = vmatprep.subr.bf16.mxu0 %v3789_v14  ;;  %s4845_s8 = sld [smem:[#allocation31_spill]]  ;;  %v4006_v42 = vmov 0.0|0.0   ;;  %s4007_s17 = smov 96   ;;  %vm4008_vm5 = vmmov 0   ;;  %v4009_v51 = vmov 0.0  }
 0x26e   : > { %v1046_v60 = vsel %vm1045_vm3, %v1040_v57, 0.0  ;;  %3405 = vmatpush3.bf16.msra.mxu0 %v3789_v14  ;;  %3612 = vmatprep.subr.bf16.mxu1 %v4006_v42  ;;  %vm1200_vm6 = vcmask 64512   ;;  %vm1296_vm8 = vcmask 138240   ;;  %vm1303_vm9 = vcmask 131072   ;;  %s4010_s2 = smov 64   ;;  %s4011_s27 = smov 88  }
 0x26f   : > { %1047 = vadd.xlane.f32.xlu0 %v1046_v60  ;;  %3406 = vmatprep.subr.bf16.mxu0 %v3790_v15  ;;  %vm4356_vm7 = vmpackc.low %vm1200_vm6, %vm1200_vm6  ;;  %s4012_s25 = smov 120   ;;  %vm1348_vm10 = vcmask 1040384   ;;  %s4015_s5 = smov 112  }
 0x270   : > { %3418 = vmatprep.mubr.msk.f32.mxu1 %vm4008_vm5, %v4009_v51  ;;  %s4016_s9 = smov 48   ;;  %s4018_s20 = smov 104  }
 0x271   : > { %v1042_v58 = vld [vmem:[#allocation2 + $0x10] sm:$0x1]  ;;  %s4019_s28 = smov 40  }
 0x272   : > { %v1041_v59 = vld [vmem:[#allocation2 + $0x8] sm:$0xff]  ;;  %v1053_v61 = vsel %vm1052_vm4, %v1042_v58, 0.0  ;;  %3407 = vmatpush3.bf16.msra.mxu0 %v3790_v15  ;;  %s4842_s29 = scalar_lea.vmem %s4841_s19, %s4213_s0  ;;  %s4844_s4 = scalar_lea.vmem %s4843_s6, %s4213_s0 }
 0x273   : > { %v1049_v62 = vsel %vm1045_vm3, %v1041_v59, 0.0  ;;  %1054 = vadd.xlane.f32.xlu1 %v1053_v61  ;;  %v3211_v27 = vld [vmem:[%s4842_s29] ss:$0 sm:$0xff]  ;;  %s4846_s22 = scalar_lea.vmem %s4845_s8, %s4213_s0  ;;  %3623 = vmatprep.subr.bf16.mxu0 %v4006_v42  ;;  %s4013_s19 = smov 56  }
 0x274   : > { %1050 = vadd.xlane.f32.xlu0 %v1049_v62  ;;  %v3212_v33 = vld [vmem:[%s4844_s4] ss:$0 sm:$0xff]  ;;  %s4014_s29 = smov 80   ;;  %s4017_s4 = smov 72  }
 0x275   : > { %v3213_v41 = vld [vmem:[%s4846_s22] ss:$0 sm:$0xff] }
 0x2fc   : > { %v1048_v63 = vpop.xlane.xlu0 %1047 }
 0x2fd   : > { %v1057_v1 = vmul.f32 0.03125, %v1048_v63 }
 0x2ff   : > { %v1060_v3 = vsub.f32 %v1040_v57, %v1057_v1 }
 0x300   : > { %v1055_v0 = vpop.xlane.xlu1 %1054 }
 0x301   : > { %v1059_v2 = vmul.f32 0.03125, %v1055_v0  ;;  %v1051_v5 = vpop.xlane.xlu0 %1050  ;;  %v1063_v7 = vmul.f32 %v1060_v3, %v1060_v3 }
 0x302   : > { %v1058_v6 = vmul.f32 0.03125, %v1051_v5 }
 0x303   : > { %v1062_v4 = vsub.f32 %v1042_v58, %v1059_v2  ;;  %v1066_v10 = vsel %vm1045_vm3, %v1063_v7, 0.0 }
 0x304   : > { %v1061_v9 = vsub.f32 %v1041_v59, %v1058_v6  ;;  %1067 = vadd.xlane.f32.xlu1 %v1066_v10 }
 0x305   : > { %v1065_v8 = vmul.f32 %v1062_v4, %v1062_v4 }
 0x306   : > { %v1064_v12 = vmul.f32 %v1061_v9, %v1061_v9 }
 0x307   : > { %v1072_v11 = vsel %vm1052_vm4, %v1065_v8, 0.0 }
 0x308   : > { %v1069_v13 = vsel %vm1045_vm3, %v1064_v12, 0.0  ;;  %1073 = vadd.xlane.f32.xlu1 %v1072_v11 }
 0x309   : > { %1070 = vadd.xlane.f32.xlu0 %v1069_v13 }
 0x391   : > { %v1068_v16 = vpop.xlane.xlu1 %1067 }
 0x392   : > { %v1075_v17 = vmul.f32 0.03125, %v1068_v16 }
 0x394   : > { %v1078_v18 = vadd.f32 1e-05, %v1075_v17 }
 0x395   : > { %v1074_v19 = vpop.xlane.xlu1 %1073 }
 0x396   : > { %v1071_v20 = vpop.xlane.xlu0 %1070  ;;  %3801 = vrsqrt.f32 %v1078_v18  ;;  %v1077_v21 = vmul.f32 0.03125, %v1074_v19 }
 0x397   : > { %v1076_v22 = vmul.f32 0.03125, %v1071_v20 }
 0x398   : > { %v1080_v23 = vadd.f32 1e-05, %v1077_v21 }
 0x399   : > { %v1079_v24 = vadd.f32 1e-05, %v1076_v22 }
 0x39a   : > { %3803 = vrsqrt.f32 %v1080_v23 }
 0x39b   : > { %3805 = vrsqrt.f32 %v1079_v24 }
 0x3a0   : > { %v3802_v25 = vpop.eup %3801 }
 0x3a1   : > { %v1084_v26 = vmul.f32 %v3802_v25, %v1060_v3 }
 0x3a3   : > { %v1093_v32 = vmul.f32 %v3211_v27, %v1084_v26 }
 0x3a4   : > { %v3804_v28 = vpop.eup %3803 }
 0x3a5   : > { %v3806_v29 = vpop.eup %3805  ;;  %v1086_v30 = vmul.f32 %v3804_v28, %v1062_v4  ;;  %v1102_v37 = vadd.f32 %v3212_v33, %v1093_v32 }
 0x3a6   : > { %v1085_v31 = vmul.f32 %v3806_v29, %v1061_v9 }
 0x3a7   : > { %v1095_v34 = vmul.f32 %v3211_v27, %v1086_v30 }
 0x3a8   : > { %v1094_v35 = vmul.f32 %v3211_v27, %v1085_v31 }
 0x3a9   : > { %v1104_v36 = vadd.f32 %v3212_v33, %v1095_v34 }
 0x3aa   : > { %v1103_v38 = vadd.f32 %v3212_v33, %v1094_v35 }
 0x3ab   : > { %v1106_v39 = vpack.c.bf16 %v1104_v36, %v1104_v36 }
 0x3ac   : > { %v1105_v40 = vpack.c.bf16 %v1103_v38, %v1102_v37 }
 0x3ae   : > { %3408 = vmatprep.mubr.msk.bf16.mxu0 %vm1045_vm3, %v1105_v40 }
 0x3af   : > { %3409 = vmatmul.mubr.msk.bf16.vlgmr.msra.gmra.mrb[0].mxu0 %vm1045_vm3, %v1106_v39 }
 0x3b0   : > { %3463 = vmatprep.mubr.msk.f32.mxu0 %vm4008_vm5, %v4009_v51 }
 0x482   : > { %v3410_v43 = vpop.f32.mrb[0].mxu0 }
 0x483   : > { %v4344_v44 = vadd.f32 %v3410_v43, %v3213_v41  ;;  %v1170_v45 = vpop.f32.mrb[1].mxu0 }
 0x484   : > { %v3411_v46 = vpop.f32.mrb[2].mxu0  ;;  %v1171_v48 = vadd.f32 %v3213_v41, %v1170_v45 }
 0x485   : > { %1198 = vrot.lane.b32.xlu1 %v4344_v44, %s4007_s17  ;;  %v1173_v47 = vpop.f32.mrb[3].mxu0  ;;  %v4378_v60 = vmul.f32 0.35355338, %v4344_v44 }
 0x486   : > { %v1174_v49 = vadd.f32 %v3213_v41, %v1173_v47  ;;  %v4364_v58 = vmul.f32 0.35355338, %v1171_v48 }
 0x488   : > { %v4347_v50 = vpack.i.bf16 %v1174_v49, %v1171_v48  ;;  %v4371_v59 = vmul.f32 0.35355338, %v1174_v49 }
 0x48a   : > { %3750 = vrot.lane.b32.xlu0 %v4347_v50, %s4007_s17  ;;  %s4849_s17 = scalar_lea.vmem %s4763_s10, %s4213_s0 }
 0x4f7   : > { %v1199_v57 = vpop.permute.xlu1 %1198 }
 0x4fc   : > { %v3751_v52 = vpop.permute.xlu0 %3750 }
 0x4fd   : > { %v3753_v53 = vunpack.i.h.bf16 %v3751_v52  ;;  %v3752_v54 = vunpack.i.l.bf16 %v3751_v52 }
 0x4ff   : > { %v3613_v56 = vpack.c.bf16 %v3753_v53, %v3752_v54 }
 0x501   : > { %3615 = vmatpush3.bf16.xpose.msk.msra.mxu1 %vm4356_vm7, %v3613_v56 }
 0x502   : > { %3416 = vmatprep.subr.mxu1 %v4009_v51 }
 0x509   : > { %3417 = vmatpush3.xpose.msk.msra.mxu1 %vm1200_vm6, %v1199_v57 }
 0x50a   : > { %3616 = vmatprep.subr.bf16.mxu1 %v4006_v42 }
 0x50c   : > { %3419 = vmatmul.mubr.msk.f32.vlgmr.msra.gmra.mrb[0].mxu1 %vm1200_vm6, %v4364_v58 }
 0x50d   : > { %3421 = vmatprep.mubr.msk.f32.mxu1 %vm4008_vm5, %v4009_v51 }
 0x510   : > { %3422 = vmatmul.mubr.msk.f32.gmra.mrb[2].mxu1 %vm1200_vm6, %v4371_v59 }
 0x511   : > { %3424 = vmatprep.mubr.msk.f32.mxu1 %vm4008_vm5, %v4009_v51 }
 0x514   : > { %3425 = vmatmul.mubr.msk.f32.gmra.mrb[4].mxu1 %vm1200_vm6, %v4378_v60 }
 0x515   : > { %3433 = vmatprep.mubr.msk.f32.mxu1 %vm4008_vm5, %v4009_v51 }
 0x5df   : > { %v1282_v61 = vpop.f32.mrb[0].mxu1 }
 0x5e0   : > { %v3420_v62 = vpop.f32.mrb[1].mxu1  ;;  %v1297_v63 = vsel %vm1296_vm8, %v1282_v61, -inf }
 0x5e1   : > { %1298 = vmax.xlane.f32.xlu1 %v1297_v63 }
 0x5e3   : > { %v1287_v0 = vpop.f32.mrb[2].mxu1 }
 0x5e4   : > { %v3423_v1 = vpop.f32.mrb[3].mxu1  ;;  %v1300_v2 = vsel %vm1296_vm8, %v1287_v0, -inf }
 0x5e5   : > { %1301 = vmax.xlane.f32.xlu0 %v1300_v2 }
 0x5e7   : > { %v1292_v3 = vpop.f32.mrb[4].mxu1 }
 0x5e8   : > { %v3426_v4 = vpop.f32.mrb[5].mxu1  ;;  %v1304_v5 = vsel %vm1303_vm9, %v1292_v3, -inf }
 0x5e9   : > { %1305 = vmax.xlane.f32.xlu0 %v1304_v5 }
 0x66e   : > { %v1299_v6 = vpop.xlane.xlu1 %1298 }
 0x66f   : > { %v1307_v7 = vsub.f32 %v1282_v61, %v1299_v6 }
 0x671   : > { %v1310_v8 = vmul.f32 1.442695, %v1307_v7 }
 0x672   : > { %v1302_v9 = vpop.xlane.xlu0 %1301 }
 0x673   : > { %3807 = vpow2.f32 %v1310_v8  ;;  %v1308_v10 = vsub.f32 %v1287_v0, %v1302_v9 }
 0x675   : > { %v1312_v11 = vmul.f32 1.442695, %v1308_v10 }
 0x676   : > { %v1306_v16 = vpop.xlane.xlu0 %1305 }
 0x677   : > { %3809 = vpow2.f32 %v1312_v11  ;;  %v1309_v17 = vsub.f32 %v1292_v3, %v1306_v16 }
 0x679   : > { %v1314_v18 = vmul.f32 1.442695, %v1309_v17  ;;  %v1188_v17 = vld [vmem:[%s4242_s26 + $0x8] sm:$0xff] }
 0x67b   : > { %3811 = vpow2.f32 %v1314_v18 }
 0x67d   : > { %v3808_v12 = vpop.eup %3807 }
 0x67e   : > { %v1316_v13 = vsel %vm1296_vm8, %v3808_v12, 0.0 }
 0x67f   : > { %1317 = vadd.xlane.f32.xlu1 %v1316_v13 }
 0x681   : > { %v3810_v14 = vpop.eup %3809 }
 0x682   : > { %v1319_v15 = vsel %vm1296_vm8, %v3810_v14, 0.0 }
 0x683   : > { %1320 = vadd.xlane.f32.xlu0 %v1319_v15 }
 0x685   : > { %v3812_v19 = vpop.eup %3811 }
 0x686   : > { %v1322_v20 = vsel %vm1303_vm9, %v3812_v19, 0.0 }
 0x690   : > { %1335 = vrot.lane.b32.xlu1 %v4344_v44, %s4010_s2 }
 0x694   : > { %3760 = vrot.lane.b32.xlu1 %v4347_v50, %s4011_s27 }
 0x698   : > { %1441 = vrot.lane.b32.xlu1 %v4344_v44, %s4011_s27  ;;  %s4850_s27 = scalar_lea.vmem %s4764_s11, %s4213_s0 }
 0x699   : > { %3755 = vrot.lane.b32.xlu0 %v4347_v50, %s4010_s2 }
 0x69d   : > { %1431 = vrot.lane.b32.xlu0 %v4364_v58, %s4012_s25 }
 0x6a1   : > { %1435 = vrot.lane.b32.xlu0 %v4378_v60, %s4012_s25 }
 0x6bc   : > { %1323 = vadd.xlane.f32.xlu1 %v1322_v20 }
 0x6cd   : > { %1433 = vrot.lane.b32.xlu1 %v4371_v59, %s4012_s25 }
 0x70c   : > { %v1318_v21 = vpop.xlane.xlu1 %1317 }
 0x70d   : > { %3813 = vrcp.f32 %v1318_v21 }
 0x710   : > { %v1321_v22 = vpop.xlane.xlu0 %1320  ;;  %v1336_v24 = vpop.permute.xlu1 %1335 }
 0x711   : > { %3815 = vrcp.f32 %v1321_v22 }
 0x714   : > { %v3756_v23 = vpop.permute.xlu0 %3755  ;;  %v3761_v29 = vpop.permute.xlu1 %3760 }
 0x715   : > { %v3758_v25 = vunpack.i.h.bf16 %v3756_v23  ;;  %v3757_v26 = vunpack.i.l.bf16 %v3756_v23  ;;  %v3763_v32 = vunpack.i.h.bf16 %v3761_v29  ;;  %v3762_v33 = vunpack.i.l.bf16 %v3761_v29 }
 0x717   : > { %v3617_v27 = vpack.c.bf16 %v3758_v25, %v3757_v26  ;;  %v3814_v28 = vpop.eup %3813  ;;  %v3620_v35 = vpack.c.bf16 %v3763_v32, %v3762_v33 }
 0x718   : > { %v1328_v30 = vmul.f32 %v3814_v28, %v3808_v12  ;;  %v1442_v36 = vpop.permute.xlu1 %1441  ;;  %v1432_v40 = vpop.permute.xlu0 %1431  ;;  %v1187_v28 = vld [vmem:[%s4242_s26] sm:$0xff] }
 0x719   : > { %3618 = vmatpush3.bf16.msra.mxu1 %v3617_v27 }
 0x71a   : > { %3431 = vmatprep.subr.mxu1 %v4009_v51 }
 0x71b   : > { %v3816_v31 = vpop.eup %3815 }
 0x71c   : > { %v1329_v34 = vmul.f32 %v3816_v31, %v3810_v14  ;;  %v1436_v43 = vpop.permute.xlu0 %1435 }
 0x71d   : > { %3432 = vmatpush3.msk.msra.mxu1 %vm1348_vm10, %v1336_v24 }
 0x71e   : > { %3434 = vmatmul.mubr.msk.f32.vlgmr.msra.gmra.mrb[6].mxu1 %vm1296_vm8, %v1328_v30  ;;  %3619 = vmatprep.subr.bf16.mxu1 %v4006_v42 }
 0x71f   : > { %3436 = vmatprep.mubr.msk.f32.mxu1 %vm4008_vm5, %v4009_v51 }
 0x722   : > { %3437 = vmatmul.mubr.msk.f32.gmra.mrb[8].mxu1 %vm1296_vm8, %v1329_v34 }
 0x723   : > { %3439 = vmatprep.mubr.msk.f32.mxu1 %vm4008_vm5, %v4009_v51 }
 0x724   : > { %3622 = vmatpush3.bf16.xpose.msk.msra.mxu1 %vm4356_vm7, %v3620_v35 }
 0x725   : > { %3446 = vmatprep.subr.mxu1 %v4009_v51 }
 0x72c   : > { %3447 = vmatpush3.xpose.msk.msra.mxu1 %vm1200_vm6, %v1442_v36 }
 0x72d   : > { %3472 = vmatprep.subr.mxu1 %v4009_v51 }
 0x749   : > { %v1324_v37 = vpop.xlane.xlu1 %1323 }
 0x74a   : > { %3817 = vrcp.f32 %v1324_v37 }
 0x74d   : > { %v1434_v41 = vpop.permute.xlu1 %1433 }
 0x754   : > { %v3818_v38 = vpop.eup %3817 }
 0x755   : > { %v1330_v39 = vmul.f32 %v3818_v38, %v3812_v19 }
 0x757   : > { %3440 = vmatmul.mubr.msk.f32.gmra.mrb[10].mxu1 %vm1296_vm8, %v1330_v39 }
 0x758   : > { %3448 = vmatprep.mubr.msk.f32.mxu1 %vm4008_vm5, %v4009_v51 }
 0x75b   : > { %3449 = vmatmul.mubr.msk.f32.vlgmr.msra.gmra.mrb[12].mxu1 %vm1200_vm6, %v1432_v40 }
 0x75c   : > { %3451 = vmatprep.mubr.msk.f32.mxu1 %vm4008_vm5, %v4009_v51  ;;  %3473 = vmatpush3.msra.mxu1 %v1188_v17 }
 0x75d   : > { %3626 = vmatprep.subr.bf16.mxu1 %v4006_v42 }
 0x75f   : > { %3452 = vmatmul.mubr.msk.f32.gmra.mrb[14].mxu1 %vm1200_vm6, %v1434_v41 }
 0x760   : > { %3454 = vmatprep.mubr.msk.f32.mxu1 %vm4008_vm5, %v4009_v51 }
 0x763   : > { %3455 = vmatmul.mubr.msk.f32.gmra.mrb[16].mxu1 %vm1200_vm6, %v1436_v43 }
 0x764   : > { %3474 = vmatprep.mubr.msk.f32.mxu1 %vm4008_vm5, %v4009_v51 }
 0x7f1   : > { %v4423_v45 = vpop.f32.mrb[6].mxu1 }
 0x7f2   : > { %v3435_v46 = vpop.f32.mrb[7].mxu1 }
 0x7f5   : > { %v4425_v47 = vpop.f32.mrb[8].mxu1 }
 0x7f6   : > { %v3438_v48 = vpop.f32.mrb[9].mxu1 }
 0x82a   : > { %v4427_v49 = vpop.f32.mrb[10].mxu1 }
 0x82b   : > { %v3441_v52 = vpop.f32.mrb[11].mxu1 }
 0x82e   : > { %v1521_v53 = vpop.f32.mrb[12].mxu1 }
 0x82f   : > { %v3450_v54 = vpop.f32.mrb[13].mxu1  ;;  %v1535_v56 = vsel %vm1296_vm8, %v1521_v53, -inf }
 0x830   : > { %1536 = vmax.xlane.f32.xlu1 %v1535_v56 }
 0x832   : > { %v1526_v57 = vpop.f32.mrb[14].mxu1 }
 0x833   : > { %v3453_v61 = vpop.f32.mrb[15].mxu1  ;;  %v1538_v62 = vsel %vm1296_vm8, %v1526_v57, -inf }
 0x834   : > { %1539 = vmax.xlane.f32.xlu0 %v1538_v62 }
 0x836   : > { %v1531_v63 = vpop.f32.mrb[16].mxu1 }
 0x837   : > { %v3456_v0 = vpop.f32.mrb[17].mxu1  ;;  %v1541_v1 = vsel %vm1303_vm9, %v1531_v63, -inf }
 0x838   : > { %1542 = vmax.xlane.f32.xlu0 %v1541_v1 }
 0x8bd   : > { %v1537_v2 = vpop.xlane.xlu1 %1536 }
 0x8be   : > { %v1544_v3 = vsub.f32 %v1521_v53, %v1537_v2 }
 0x8c0   : > { %v1547_v4 = vmul.f32 1.442695, %v1544_v3 }
 0x8c1   : > { %v1540_v5 = vpop.xlane.xlu0 %1539 }
 0x8c2   : > { %3819 = vpow2.f32 %v1547_v4  ;;  %v1545_v6 = vsub.f32 %v1526_v57, %v1540_v5 }
 0x8c4   : > { %v1549_v7 = vmul.f32 1.442695, %v1545_v6 }
 0x8c5   : > { %v1543_v8 = vpop.xlane.xlu0 %1542 }
 0x8c6   : > { %3821 = vpow2.f32 %v1549_v7  ;;  %v1546_v9 = vsub.f32 %v1531_v63, %v1543_v8 }
 0x8c8   : > { %v1551_v10 = vmul.f32 1.442695, %v1546_v9 }
 0x8ca   : > { %3823 = vpow2.f32 %v1551_v10 }
 0x8cc   : > { %v3820_v11 = vpop.eup %3819 }
 0x8cd   : > { %v1553_v12 = vsel %vm1296_vm8, %v3820_v11, 0.0 }
 0x8ce   : > { %1554 = vadd.xlane.f32.xlu0 %v1553_v12 }
 0x8d0   : > { %v3822_v13 = vpop.eup %3821 }
 0x8d1   : > { %v1556_v14 = vsel %vm1296_vm8, %v3822_v13, 0.0 }
 0x8d2   : > { %1557 = vadd.xlane.f32.xlu1 %v1556_v14 }
 0x8d4   : > { %v3824_v15 = vpop.eup %3823 }
 0x8d5   : > { %v1559_v16 = vsel %vm1303_vm9, %v3824_v15, 0.0 }
 0x8d6   : > { %1560 = vadd.xlane.f32.xlu0 %v1559_v16 }
 0x8e3   : > { %3765 = vrot.lane.b32.xlu1 %v4347_v50, %s4013_s19 }
 0x8e7   : > { %3770 = vrot.lane.b32.xlu1 %v4347_v50, %s4014_s29 }
 0x8eb   : > { %1855 = vrot.lane.b32.xlu1 %v4344_v44, %s4014_s29  ;;  %s4851_s29 = scalar_lea.vmem %s4765_s12, %s4213_s0 }
 0x8ec   : > { %1572 = vrot.lane.b32.xlu0 %v4344_v44, %s4013_s19 }
 0x8ef   : > { %1845 = vrot.lane.b32.xlu1 %v4364_v58, %s4015_s5 }
 0x8f0   : > { %1847 = vrot.lane.b32.xlu0 %v4371_v59, %s4015_s5 }
 0x8f3   : > { %1849 = vrot.lane.b32.xlu1 %v4378_v60, %s4015_s5 }
 0x95b   : > { %v1555_v18 = vpop.xlane.xlu0 %1554 }
 0x95c   : > { %3825 = vrcp.f32 %v1555_v18 }
 0x95f   : > { %v1558_v19 = vpop.xlane.xlu1 %1557 }
 0x960   : > { %3827 = vrcp.f32 %v1558_v19 }
 0x963   : > { %v3766_v20 = vpop.permute.xlu1 %3765  ;;  %v1561_v21 = vpop.xlane.xlu0 %1560 }
 0x964   : > { %v3768_v22 = vunpack.i.h.bf16 %v3766_v20  ;;  %v3767_v23 = vunpack.i.l.bf16 %v3766_v20  ;;  %3829 = vrcp.f32 %v1561_v21 }
 0x966   : > { %v3624_v24 = vpack.c.bf16 %v3768_v22, %v3767_v23  ;;  %v3826_v25 = vpop.eup %3825 }
 0x967   : > { %v1565_v26 = vmul.f32 %v3826_v25, %v3820_v11  ;;  %v1573_v27 = vpop.permute.xlu0 %1572  ;;  %v3771_v33 = vpop.permute.xlu1 %3770 }
 0x968   : > { %3625 = vmatpush3.bf16.msra.mxu0 %v3624_v24  ;;  %v3773_v34 = vunpack.i.h.bf16 %v3771_v33  ;;  %v3772_v35 = vunpack.i.l.bf16 %v3771_v33 }
 0x969   : > { %3461 = vmatprep.subr.mxu0 %v4009_v51 }
 0x96a   : > { %v3828_v29 = vpop.eup %3827  ;;  %v3627_v36 = vpack.c.bf16 %v3773_v34, %v3772_v35 }
 0x96b   : > { %v1566_v30 = vmul.f32 %v3828_v29, %v3822_v13  ;;  %v1856_v41 = vpop.permute.xlu1 %1855 }
 0x96c   : > { %3462 = vmatpush3.msk.msra.mxu0 %vm1348_vm10, %v1573_v27 }
 0x96d   : > { %3464 = vmatmul.mubr.msk.f32.vlgmr.msra.gmra.mrb[4].mxu0 %vm1296_vm8, %v1565_v26  ;;  %3483 = vmatprep.subr.mxu0 %v4009_v51 }
 0x96e   : > { %3466 = vmatprep.mubr.msk.f32.mxu0 %vm4008_vm5, %v4009_v51  ;;  %3484 = vmatpush3.msra.mxu0 %v1187_v28  ;;  %v3830_v31 = vpop.eup %3829 }
 0x96f   : > { %3630 = vmatprep.subr.bf16.mxu0 %v4006_v42  ;;  %v1567_v32 = vmul.f32 %v3830_v31, %v3824_v15  ;;  %v1846_v46 = vpop.permute.xlu1 %1845 }
 0x971   : > { %3467 = vmatmul.mubr.msk.f32.gmra.mrb[6].mxu0 %vm1296_vm8, %v1566_v30 }
 0x972   : > { %3469 = vmatprep.mubr.msk.f32.mxu0 %vm4008_vm5, %v4009_v51 }
 0x973   : > { %v1850_v54 = vpop.permute.xlu1 %1849 }
 0x975   : > { %3470 = vmatmul.mubr.msk.f32.gmra.mrb[8].mxu0 %vm1296_vm8, %v1567_v32 }
 0x976   : > { %3485 = vmatprep.mubr.msk.f32.mxu0 %vm4008_vm5, %v4009_v51 }
 0x979   : > { %3486 = vmatmul.mubr.msk.f32.vlgmr.msra.gmra.mrb[10].mxu0 %vm1200_vm6, %v4423_v45 }
 0x97a   : > { %3488 = vmatprep.mubr.msk.f32.mxu0 %vm4008_vm5, %v4009_v51 }
 0x97d   : > { %3489 = vmatmul.mubr.msk.f32.gmra.mrb[12].mxu0 %vm1200_vm6, %v4425_v47 }
 0x97e   : > { %3491 = vmatprep.mubr.msk.f32.mxu0 %vm4008_vm5, %v4009_v51 }
 0x981   : > { %3492 = vmatmul.mubr.msk.f32.gmra.mrb[14].mxu0 %vm1200_vm6, %v4427_v49  ;;  %v1848_v49 = vpop.permute.xlu0 %1847 }
 0x982   : > { %3515 = vmatprep.mubr.msk.f32.mxu0 %vm4008_vm5, %v4009_v51 }
 0xa40   : > { %v1653_v37 = vpop.f32.mrb[4].mxu0 }
 0xa41   : > { %v3465_v38 = vpop.f32.mrb[5].mxu0  ;;  %3475 = vmatmul.mubr.msk.f32.vlgmr.msra.gmra.mrb[18].mxu1 %vm1200_vm6, %v1653_v37 }
 0xa42   : > { %3629 = vmatpush3.bf16.xpose.msk.msra.mxu1 %vm4356_vm7, %v3627_v36  ;;  %3477 = vmatprep.mubr.msk.f32.mxu1 %vm4008_vm5, %v4009_v51 }
 0xa43   : > { %3498 = vmatprep.subr.mxu1 %v4009_v51 }
 0xa44   : > { %v1658_v39 = vpop.f32.mrb[6].mxu0 }
 0xa45   : > { %v3468_v40 = vpop.f32.mrb[7].mxu0  ;;  %3478 = vmatmul.mubr.msk.f32.gmra.mrb[20].mxu1 %vm1200_vm6, %v1658_v39 }
 0xa46   : > { %3480 = vmatprep.mubr.msk.f32.mxu1 %vm4008_vm5, %v4009_v51 }
 0xa48   : > { %v1663_v43 = vpop.f32.mrb[8].mxu0 }
 0xa49   : > { %v3471_v45 = vpop.f32.mrb[9].mxu0  ;;  %3481 = vmatmul.mubr.msk.f32.gmra.mrb[22].mxu1 %vm1200_vm6, %v1663_v43 }
 0xa4a   : > { %3499 = vmatpush3.xpose.msk.msra.mxu1 %vm1200_vm6, %v1856_v41  ;;  %3500 = vmatprep.mubr.msk.f32.mxu1 %vm4008_vm5, %v4009_v51 }
 0xa4b   : > { %3524 = vmatprep.subr.mxu1 %v4009_v51 }
 0xa4c   : > { %v1831_v47 = vpop.f32.mrb[10].mxu0 }
 0xa4d   : > { %v3487_v48 = vpop.f32.mrb[11].mxu0  ;;  %3501 = vmatmul.mubr.msk.f32.vlgmr.msra.gmra.mrb[24].mxu1 %vm1200_vm6, %v1846_v46 }
 0xa4e   : > { %3503 = vmatprep.mubr.msk.f32.mxu1 %vm4008_vm5, %v4009_v51 }
 0xa50   : > { %v1836_v52 = vpop.f32.mrb[12].mxu0 }
 0xa51   : > { %v3490_v53 = vpop.f32.mrb[13].mxu0  ;;  %3504 = vmatmul.mubr.msk.f32.gmra.mrb[26].mxu1 %vm1200_vm6, %v1848_v49 }
 0xa52   : > { %3506 = vmatprep.mubr.msk.f32.mxu1 %vm4008_vm5, %v4009_v51 }
 0xa54   : > { %v1841_v56 = vpop.f32.mrb[14].mxu0 }
 0xa55   : > { %v3493_v57 = vpop.f32.mrb[15].mxu0  ;;  %3507 = vmatmul.mubr.msk.f32.gmra.mrb[28].mxu1 %vm1200_vm6, %v1850_v54 }
 0xa56   : > { %3526 = vmatprep.mubr.msk.f32.mxu1 %vm4008_vm5, %v4009_v51 }
 0xb14   : > { %v1742_v61 = vpop.f32.mrb[18].mxu1 }
 0xb15   : > { %v4493_v62 = vadd.f32 %v1831_v47, %v1742_v61  ;;  %v3476_v63 = vpop.f32.mrb[19].mxu1 }
 0xb18   : > { %v1747_v0 = vpop.f32.mrb[20].mxu1 }
 0xb19   : > { %v4495_v1 = vadd.f32 %v1836_v52, %v1747_v0  ;;  %v3479_v2 = vpop.f32.mrb[21].mxu1  ;;  %v1189_v52 = vld [vmem:[%s4242_s26 + $0x10] sm:$0xff] }
 0xb1a   : > { %3525 = vmatpush3.msra.mxu1 %v1189_v52 }
 0xb1b   : > { %3637 = vmatprep.subr.bf16.mxu1 %v4006_v42 }
 0xb1c   : > { %v1752_v3 = vpop.f32.mrb[22].mxu1 }
 0xb1d   : > { %v4497_v4 = vadd.f32 %v1841_v56, %v1752_v3  ;;  %v3482_v5 = vpop.f32.mrb[23].mxu1 }
 0xb20   : > { %v1935_v6 = vpop.f32.mrb[24].mxu1 }
 0xb21   : > { %v3502_v7 = vpop.f32.mrb[25].mxu1  ;;  %v1949_v8 = vsel %vm1296_vm8, %v1935_v6, -inf }
 0xb22   : > { %1950 = vmax.xlane.f32.xlu0 %v1949_v8 }
 0xb24   : > { %v1940_v9 = vpop.f32.mrb[26].mxu1 }
 0xb25   : > { %v3505_v10 = vpop.f32.mrb[27].mxu1  ;;  %v1952_v11 = vsel %vm1296_vm8, %v1940_v9, -inf }
 0xb26   : > { %1953 = vmax.xlane.f32.xlu1 %v1952_v11 }
 0xb28   : > { %v1945_v12 = vpop.f32.mrb[28].mxu1 }
 0xb29   : > { %v3508_v13 = vpop.f32.mrb[29].mxu1  ;;  %v1955_v14 = vsel %vm1303_vm9, %v1945_v12, -inf }
 0xb2a   : > { %1956 = vmax.xlane.f32.xlu0 %v1955_v14 }
 0xb37   : > { %1986 = vrot.lane.b32.xlu1 %v4344_v44, %s4016_s9 }
 0xb3b   : > { %3780 = vrot.lane.b32.xlu1 %v4347_v50, %s4017_s4 }
 0xb3f   : > { %2183 = vrot.lane.b32.xlu1 %v4344_v44, %s4017_s4  ;;  %s4852_s4 = scalar_lea.vmem %s4767_s14, %s4213_s0  ;;  %s4853_s0 = sld [smem:[#allocation12_spill]] }
 0xb45   : > { %p3287_p1 = scmp.ne.s32.totalorder %s4853_s0, 1 }
 0xb46   : > { %vm4021_vm11 = vmmov (!%p3287_p1), 0   ;;  %s4856_s25 = sld [smem:[#allocation33_spill]] (!%p3287_p1)  ;;  %s4857_s5 = sld [smem:[#allocation34_spill]] (!%p3287_p1)  ;;  %vm2932_vm12 = vcmask (!%p3287_p1), 122880  }
 0xbaf   : > { %v1951_v15 = vpop.xlane.xlu0 %1950 }
 0xbb0   : > { %v1958_v16 = vsub.f32 %v1935_v6, %v1951_v15 }
 0xbb2   : > { %v1961_v17 = vmul.f32 1.442695, %v1958_v16 }
 0xbb3   : > { %v1954_v18 = vpop.xlane.xlu1 %1953 }
 0xbb4   : > { %3831 = vpow2.f32 %v1961_v17  ;;  %v1959_v19 = vsub.f32 %v1940_v9, %v1954_v18 }
 0xbb6   : > { %v1963_v20 = vmul.f32 1.442695, %v1959_v19 }
 0xbb7   : > { %v1957_v21 = vpop.xlane.xlu0 %1956  ;;  %v1987_v30 = vpop.permute.xlu1 %1986 }
 0xbb8   : > { %3833 = vpow2.f32 %v1963_v20  ;;  %v1960_v22 = vsub.f32 %v1945_v12, %v1957_v21 }
 0xbba   : > { %v1965_v23 = vmul.f32 1.442695, %v1960_v22 }
 0xbbb   : > { %v3781_v31 = vpop.permute.xlu1 %3780 }
 0xbbc   : > { %3835 = vpow2.f32 %v1965_v23  ;;  %v3782_v41 = vunpack.i.l.bf16 %v3781_v31 }
 0xbbe   : > { %v3832_v24 = vpop.eup %3831 }
 0xbbf   : > { %v1967_v25 = vsel %vm1296_vm8, %v3832_v24, 0.0  ;;  %v2184_v33 = vpop.permute.xlu1 %2183 }
 0xbc0   : > { %1968 = vadd.xlane.f32.xlu0 %v1967_v25 }
 0xbc2   : > { %v3834_v26 = vpop.eup %3833 }
 0xbc3   : > { %v1970_v27 = vsel %vm1296_vm8, %v3834_v26, 0.0 }
 0xbc4   : > { %1971 = vadd.xlane.f32.xlu0 %v1970_v27 }
 0xbc6   : > { %v3836_v28 = vpop.eup %3835 }
 0xbc7   : > { %v1973_v29 = vsel %vm1303_vm9, %v3836_v28, 0.0 }
 0xbc8   : > { %1974 = vadd.xlane.f32.xlu1 %v1973_v29  ;;  %v1190_v29 = vld [vmem:[%s4242_s26 + $0x18] sm:$0xff]  ;;  %s4854_s26 = sld [smem:[#allocation35_spill]] (!%p3287_p1) }
 0xbce   : > { %s4855_s22 = smov (!%p3287_p1), %s4854_s26 }
 0xbd9   : > { %2175 = vrot.lane.b32.xlu1 %v4371_v59, %s4018_s20 }
 0xbda   : > { %3775 = vrot.lane.b32.xlu0 %v4347_v50, %s4016_s9 }
 0xbde   : > { %2173 = vrot.lane.b32.xlu0 %v4364_v58, %s4018_s20 }
 0xbe2   : > { %2177 = vrot.lane.b32.xlu0 %v4378_v60, %s4018_s20  ;;  %v3783_v60 = vunpack.i.h.bf16 %v3781_v31 }
 0xbe4   : > { %v3634_v46 = vpack.c.bf16 %v3783_v60, %v3782_v41 }
 0xc4d   : > { %v1969_v32 = vpop.xlane.xlu0 %1968 }
 0xc4e   : > { %3837 = vrcp.f32 %v1969_v32 }
 0xc51   : > { %v1972_v34 = vpop.xlane.xlu0 %1971 }
 0xc52   : > { %3839 = vrcp.f32 %v1972_v34 }
 0xc55   : > { %v1975_v35 = vpop.xlane.xlu1 %1974  ;;  %v3776_v36 = vpop.permute.xlu0 %3775 }
 0xc56   : > { %v3778_v37 = vunpack.i.h.bf16 %v3776_v36  ;;  %v3777_v38 = vunpack.i.l.bf16 %v3776_v36  ;;  %3841 = vrcp.f32 %v1975_v35 }
 0xc58   : > { %v3631_v39 = vpack.c.bf16 %v3778_v37, %v3777_v38  ;;  %v3838_v59 = vpop.eup %3837 }
 0xc59   : > { %v1979_v58 = vmul.f32 %v3838_v59, %v3832_v24  ;;  %v2174_v48 = vpop.permute.xlu0 %2173  ;;  %v2176_v55 = vpop.permute.xlu1 %2175 }
 0xc5a   : > { %3632 = vmatpush3.bf16.msra.mxu0 %v3631_v39 }
 0xc5b   : > { %3513 = vmatprep.subr.mxu0 %v4009_v51 }
 0xc5c   : > { %v3840_v40 = vpop.eup %3839 }
 0xc5d   : > { %v1980_v43 = vmul.f32 %v3840_v40, %v3834_v26  ;;  %v2178_v49 = vpop.permute.xlu0 %2177 }
 0xc5e   : > { %3514 = vmatpush3.msk.msra.mxu0 %vm1348_vm10, %v1987_v30 }
 0xc5f   : > { %3516 = vmatmul.mubr.msk.f32.vlgmr.msra.gmra.mrb[16].mxu0 %vm1296_vm8, %v1979_v58  ;;  %3633 = vmatprep.subr.bf16.mxu0 %v4006_v42 }
 0xc60   : > { %3518 = vmatprep.mubr.msk.f32.mxu0 %vm4008_vm5, %v4009_v51  ;;  %v3842_v45 = vpop.eup %3841 }
 0xc61   : > { %v1981_v47 = vmul.f32 %v3842_v45, %v3836_v28 }
 0xc63   : > { %3519 = vmatmul.mubr.msk.f32.gmra.mrb[18].mxu0 %vm1296_vm8, %v1980_v43 }
 0xc64   : > { %3521 = vmatprep.mubr.msk.f32.mxu0 %vm4008_vm5, %v4009_v51 }
 0xc65   : > { %3636 = vmatpush3.bf16.xpose.msk.msra.mxu0 %vm4356_vm7, %v3634_v46 }
 0xc66   : > { %3539 = vmatprep.subr.mxu0 %v4009_v51 }
 0xc67   : > { %3522 = vmatmul.mubr.msk.f32.gmra.mrb[20].mxu0 %vm1296_vm8, %v1981_v47 }
 0xc68   : > { %3541 = vmatprep.mubr.msk.f32.mxu0 %vm4008_vm5, %v4009_v51 }
 0xc6d   : > { %3540 = vmatpush3.xpose.msk.msra.mxu0 %vm1200_vm6, %v2184_v33 }
 0xc6e   : > { %3565 = vmatprep.subr.mxu0 %v4009_v51 }
 0xc70   : > { %3542 = vmatmul.mubr.msk.f32.vlgmr.msra.gmra.mrb[22].mxu0 %vm1200_vm6, %v2174_v48 }
 0xc71   : > { %3544 = vmatprep.mubr.msk.f32.mxu0 %vm4008_vm5, %v4009_v51  ;;  %3566 = vmatpush3.msra.mxu0 %v1190_v29  ;;  %v3792_v29 = vld [vmem:[%s4259_s7 + $0x8] sm:$0xff]  }
 0xc74   : > { %3545 = vmatmul.mubr.msk.f32.gmra.mrb[24].mxu0 %vm1200_vm6, %v2176_v55 }
 0xc75   : > { %3547 = vmatprep.mubr.msk.f32.mxu0 %vm4008_vm5, %v4009_v51 }
 0xc78   : > { %3548 = vmatmul.mubr.msk.f32.gmra.mrb[26].mxu0 %vm1200_vm6, %v2178_v49 }
 0xc79   : > { %3567 = vmatprep.mubr.msk.f32.mxu0 %vm4008_vm5, %v4009_v51 }
 0xd32   : > { %v2067_v53 = vpop.f32.mrb[16].mxu0 }
 0xd33   : > { %v3517_v54 = vpop.f32.mrb[17].mxu0  ;;  %3527 = vmatmul.mubr.msk.f32.vlgmr.msra.gmra.mrb[30].mxu1 %vm1200_vm6, %v2067_v53  ;;  %v3270_v53 = vld [vmem:[%s4849_s17] ss:$0 sm:$0xff] }
 0xd34   : > { %3529 = vmatprep.mubr.msk.f32.mxu1 %vm4008_vm5, %v4009_v51  ;;  %v3867_v54 = vld [vmem:[#allocation2] sm:$0xff] }
 0xd36   : > { %v2072_v56 = vpop.f32.mrb[18].mxu0 }
 0xd37   : > { %v3520_v57 = vpop.f32.mrb[19].mxu0  ;;  %3530 = vmatmul.mubr.msk.f32.gmra.mrb[32].mxu1 %vm1200_vm6, %v2072_v56 }
 0xd38   : > { %3532 = vmatprep.mubr.msk.f32.mxu1 %vm4008_vm5, %v4009_v51 }
 0xd3a   : > { %v2077_v61 = vpop.f32.mrb[20].mxu0 }
 0xd3b   : > { %v3523_v63 = vpop.f32.mrb[21].mxu0  ;;  %3533 = vmatmul.mubr.msk.f32.gmra.mrb[34].mxu1 %vm1200_vm6, %v2077_v61 }
 0xd3c   : > { %3556 = vmatprep.mubr.msk.f32.mxu1 %vm4008_vm5, %v4009_v51 }
 0xd43   : > { %v2263_v42 = vpop.f32.mrb[22].mxu0 }
 0xd44   : > { %v3543_v0 = vpop.f32.mrb[23].mxu0  ;;  %v2277_v2 = vsel %vm1296_vm8, %v2263_v42, -inf }
 0xd45   : > { %2278 = vmax.xlane.f32.xlu1 %v2277_v2 }
 0xd47   : > { %v2268_v3 = vpop.f32.mrb[24].mxu0 }
 0xd48   : > { %v3546_v5 = vpop.f32.mrb[25].mxu0  ;;  %v2280_v6 = vsel %vm1296_vm8, %v2268_v3, -inf }
 0xd49   : > { %2281 = vmax.xlane.f32.xlu0 %v2280_v6 }
 0xd4b   : > { %v2273_v7 = vpop.f32.mrb[26].mxu0 }
 0xd4c   : > { %v3549_v8 = vpop.f32.mrb[27].mxu0  ;;  %v2283_v9 = vsel %vm1303_vm9, %v2273_v7, -inf }
 0xd4d   : > { %2284 = vmax.xlane.f32.xlu0 %v2283_v9  ;;  %v3869_v8 = vld [vmem:[#allocation2 + $0x10] sm:$0x1] }
 0xdd2   : > { %v2279_v10 = vpop.xlane.xlu1 %2278 }
 0xdd3   : > { %v2286_v11 = vsub.f32 %v2263_v42, %v2279_v10 }
 0xdd5   : > { %v2289_v12 = vmul.f32 1.442695, %v2286_v11 }
 0xdd6   : > { %v2282_v13 = vpop.xlane.xlu0 %2281 }
 0xdd7   : > { %3843 = vpow2.f32 %v2289_v12  ;;  %v2287_v14 = vsub.f32 %v2268_v3, %v2282_v13 }
 0xdd9   : > { %v2291_v15 = vmul.f32 1.442695, %v2287_v14 }
 0xdda   : > { %v2285_v16 = vpop.xlane.xlu0 %2284 }
 0xddb   : > { %3845 = vpow2.f32 %v2291_v15  ;;  %v2288_v17 = vsub.f32 %v2273_v7, %v2285_v16 }
 0xddd   : > { %v2293_v18 = vmul.f32 1.442695, %v2288_v17 }
 0xddf   : > { %3847 = vpow2.f32 %v2293_v18 }
 0xde1   : > { %v3844_v19 = vpop.eup %3843 }
 0xde2   : > { %v2295_v20 = vsel %vm1296_vm8, %v3844_v19, 0.0 }
 0xde3   : > { %2296 = vadd.xlane.f32.xlu0 %v2295_v20 }
 0xde5   : > { %v3846_v21 = vpop.eup %3845 }
 0xde6   : > { %v2298_v22 = vsel %vm1296_vm8, %v3846_v21, 0.0 }
 0xde7   : > { %2299 = vadd.xlane.f32.xlu1 %v2298_v22 }
 0xde9   : > { %v3848_v23 = vpop.eup %3847 }
 0xdea   : > { %v2301_v24 = vsel %vm1303_vm9, %v3848_v23, 0.0 }
 0xdeb   : > { %2302 = vadd.xlane.f32.xlu0 %v2301_v24 }
 0xdf8   : > { %3785 = vrot.lane.b32.xlu1 %v4347_v50, %s4019_s28 }
 0xe01   : > { %2314 = vrot.lane.b32.xlu0 %v4344_v44, %s4019_s28 }
 0xe06   : > { %v2156_v25 = vpop.f32.mrb[30].mxu1 }
 0xe07   : > { %v2170_v26 = vadd.f32 %v2156_v25, %v4493_v62  ;;  %v3528_v27 = vpop.f32.mrb[31].mxu1 }
 0xe0a   : > { %v2161_v28 = vpop.f32.mrb[32].mxu1 }
 0xe0b   : > { %v2171_v30 = vadd.f32 %v2161_v28, %v4495_v1  ;;  %v3531_v31 = vpop.f32.mrb[33].mxu1  ;;  %v3791_v28 = vld [vmem:[%s4259_s7] sm:$0xff]  }
 0xe0e   : > { %v2166_v32 = vpop.f32.mrb[34].mxu1 }
 0xe0f   : > { %v2172_v33 = vadd.f32 %v2166_v32, %v4497_v4  ;;  %v3534_v34 = vpop.f32.mrb[35].mxu1 }
 0xe70   : > { %v2297_v35 = vpop.xlane.xlu0 %2296 }
 0xe71   : > { %3849 = vrcp.f32 %v2297_v35 }
 0xe74   : > { %v2300_v36 = vpop.xlane.xlu1 %2299 }
 0xe75   : > { %3851 = vrcp.f32 %v2300_v36 }
 0xe78   : > { %v3786_v50 = vpop.permute.xlu1 %3785  ;;  %v2303_v44 = vpop.xlane.xlu0 %2302 }
 0xe79   : > { %v3788_v37 = vunpack.i.h.bf16 %v3786_v50  ;;  %v3787_v38 = vunpack.i.l.bf16 %v3786_v50  ;;  %3853 = vrcp.f32 %v2303_v44 }
 0xe7b   : > { %v3638_v62 = vpack.c.bf16 %v3788_v37, %v3787_v38  ;;  %v3850_v39 = vpop.eup %3849 }
 0xe7c   : > { %v2307_v1 = vmul.f32 %v3850_v39, %v3844_v19  ;;  %v2315_v59 = vpop.permute.xlu0 %2314 }
 0xe7d   : > { %3639 = vmatpush3.bf16.msra.mxu1 %v3638_v62  ;;  %v3271_v62 = vld [vmem:[%s4850_s27] ss:$0 sm:$0xff] }
 0xe7e   : > { %3554 = vmatprep.subr.mxu1 %v4009_v51 }
 0xe7f   : > { %v3852_v58 = vpop.eup %3851 }
 0xe80   : > { %v2308_v4 = vmul.f32 %v3852_v58, %v3846_v21  ;;  %v3272_v58 = vld [vmem:[%s4851_s29] ss:$0 sm:$0xff] }
 0xe81   : > { %3555 = vmatpush3.msk.msra.mxu1 %vm1348_vm10, %v2315_v59 }
 0xe82   : > { %3557 = vmatmul.mubr.msk.f32.vlgmr.msra.gmra.mrb[36].mxu1 %vm1296_vm8, %v2307_v1  ;;  %3576 = vmatprep.subr.bf16.mxu1 %v3791_v28 }
 0xe83   : > { %3559 = vmatprep.mubr.msk.f32.mxu1 %vm4008_vm5, %v4009_v51  ;;  %v3854_v40 = vpop.eup %3853  ;;  %3577 = vmatpush3.bf16.msra.mxu1 %v3791_v28 }
 0xe84   : > { %v2309_v60 = vmul.f32 %v3854_v40, %v3848_v23  ;;  %3578 = vmatprep.subr.bf16.mxu1 %v3792_v29 }
 0xe86   : > { %3560 = vmatmul.mubr.msk.f32.gmra.mrb[38].mxu1 %vm1296_vm8, %v2308_v4 }
 0xe87   : > { %3562 = vmatprep.mubr.msk.f32.mxu1 %vm4008_vm5, %v4009_v51  ;;  %3579 = vmatpush3.bf16.msra.mxu1 %v3792_v29 }
 0xe8a   : > { %3563 = vmatmul.mubr.msk.f32.gmra.mrb[40].mxu1 %vm1296_vm8, %v2309_v60 }
 0xf55   : > { %v2395_v41 = vpop.f32.mrb[36].mxu1 }
 0xf56   : > { %v3558_v43 = vpop.f32.mrb[37].mxu1  ;;  %3568 = vmatmul.mubr.msk.f32.vlgmr.msra.gmra.mrb[28].mxu0 %vm1200_vm6, %v2395_v41 }
 0xf57   : > { %3570 = vmatprep.mubr.msk.f32.mxu0 %vm4008_vm5, %v4009_v51 }
 0xf59   : > { %v2400_v45 = vpop.f32.mrb[38].mxu1 }
 0xf5a   : > { %v3561_v46 = vpop.f32.mrb[39].mxu1  ;;  %3571 = vmatmul.mubr.msk.f32.gmra.mrb[30].mxu0 %vm1200_vm6, %v2400_v45 }
 0xf5b   : > { %3573 = vmatprep.mubr.msk.f32.mxu0 %vm4008_vm5, %v4009_v51  ;;  %v3868_v51 = vld [vmem:[#allocation2 + $0x8] sm:$0xff] }
 0xf5d   : > { %v2405_v47 = vpop.f32.mrb[40].mxu1 }
 0xf5e   : > { %v3564_v48 = vpop.f32.mrb[41].mxu1  ;;  %3574 = vmatmul.mubr.msk.f32.gmra.mrb[32].mxu0 %vm1200_vm6, %v2405_v47 }
0x1029   : > { %v2484_v55 = vpop.f32.mrb[28].mxu0 }
0x102a   : > { %v2498_v49 = vadd.f32 %v2484_v55, %v2170_v26  ;;  %v3569_v52 = vpop.f32.mrb[29].mxu0  ;;  %v3793_v55 = vld [vmem:[%s4273_s3] sm:$0xff]  }
0x102b   : > { %3584 = vmatprep.subr.bf16.mxu0 %v3793_v55  ;;  %v3795_v52 = vld [vmem:[%s4273_s3 + $0x10] sm:$0xff]  }
0x102c   : > { %v2501_v56 = vadd.f32 %v3867_v54, %v2498_v49  ;;  %3585 = vmatpush3.bf16.msra.mxu0 %v3793_v55  ;;  %v3794_v49 = vld [vmem:[%s4273_s3 + $0x8] sm:$0xff]   ;;  %v3797_v54 = vld [vmem:[%s4273_s3 + $0x20] sm:$0xff]  }
0x102d   : > { %v2489_v57 = vpop.f32.mrb[30].mxu0  ;;  %3586 = vmatprep.subr.bf16.mxu0 %v3794_v49 }
0x102e   : > { %v4582_v61 = vadd.f32 %v3270_v53, %v2501_v56  ;;  %v2499_v63 = vadd.f32 %v2489_v57, %v2171_v30  ;;  %v3572_v42 = vpop.f32.mrb[31].mxu0  ;;  %v3798_v56 = vld [vmem:[%s4273_s3 + $0x28] sm:$0xff]   ;;  %v3799_v57 = vld [vmem:[%s4273_s3 + $0x30] sm:$0xff]  }
0x102f   : > { %v3273_v42 = vld [vmem:[%s4852_s4] ss:$0 sm:$0xff] }
0x1030   : > { %v2502_v0 = vadd.f32 %v3868_v51, %v2499_v63  ;;  %v2516_v2 = vsel %vm1045_vm3, %v4582_v61, 0.0  ;;  %3587 = vmatpush3.bf16.msra.mxu0 %v3794_v49  ;;  %v3800_v63 = vld [vmem:[%s4273_s3 + $0x38] sm:$0xff]  }
0x1031   : > { %2517 = vadd.xlane.f32.xlu1 %v2516_v2  ;;  %v2494_v3 = vpop.f32.mrb[32].mxu0  ;;  %3588 = vmatprep.subr.bf16.mxu0 %v3795_v52 }
0x1032   : > { %v4586_v5 = vadd.f32 %v3270_v53, %v2502_v0  ;;  %v2500_v6 = vadd.f32 %v2494_v3, %v2172_v33  ;;  %v3575_v7 = vpop.f32.mrb[33].mxu0 }
0x1034   : > { %v2503_v9 = vadd.f32 %v3869_v8, %v2500_v6  ;;  %v2519_v10 = vsel %vm1045_vm3, %v4586_v5, 0.0  ;;  %3589 = vmatpush3.bf16.msra.mxu0 %v3795_v52 }
0x1035   : > { %2520 = vadd.xlane.f32.xlu0 %v2519_v10 }
0x1036   : > { %v4590_v11 = vadd.f32 %v3270_v53, %v2503_v9  ;;  %v3796_v53 = vld [vmem:[%s4273_s3 + $0x18] sm:$0xff]  }
0x1037   : > { %3590 = vmatprep.subr.bf16.mxu0 %v3796_v53 }
0x1038   : > { %v2522_v12 = vsel %vm1052_vm4, %v4590_v11, 0.0  ;;  %3591 = vmatpush3.bf16.msra.mxu0 %v3796_v53 }
0x1039   : > { %2523 = vadd.xlane.f32.xlu1 %v2522_v12  ;;  %3592 = vmatprep.subr.bf16.mxu0 %v3797_v54 }
0x103c   : > { %3593 = vmatpush3.bf16.msra.mxu0 %v3797_v54 }
0x103d   : > { %3594 = vmatprep.subr.bf16.mxu0 %v3798_v56 }
0x1040   : > { %3595 = vmatpush3.bf16.msra.mxu0 %v3798_v56 }
0x1041   : > { %3596 = vmatprep.subr.bf16.mxu0 %v3799_v57 }
0x1044   : > { %3597 = vmatpush3.bf16.msra.mxu0 %v3799_v57 }
0x1045   : > { %3598 = vmatprep.subr.bf16.mxu0 %v3800_v63 }
0x1048   : > { %3599 = vmatpush3.bf16.msra.mxu0 %v3800_v63 }
0x10be   : > { %v2518_v13 = vpop.xlane.xlu1 %2517 }
0x10bf   : > { %v2525_v14 = vmul.f32 0.03125, %v2518_v13 }
0x10c1   : > { %v2528_v15 = vsub.f32 %v4582_v61, %v2525_v14 }
0x10c2   : > { %v2521_v16 = vpop.xlane.xlu0 %2520 }
0x10c3   : > { %v2526_v17 = vmul.f32 0.03125, %v2521_v16  ;;  %v2531_v18 = vmul.f32 %v2528_v15, %v2528_v15 }
0x10c5   : > { %v2529_v19 = vsub.f32 %v4586_v5, %v2526_v17  ;;  %v2534_v20 = vsel %vm1045_vm3, %v2531_v18, 0.0 }
0x10c6   : > { %2535 = vadd.xlane.f32.xlu0 %v2534_v20  ;;  %v2524_v21 = vpop.xlane.xlu1 %2523 }
0x10c7   : > { %v2527_v22 = vmul.f32 0.03125, %v2524_v21  ;;  %v2532_v23 = vmul.f32 %v2529_v19, %v2529_v19 }
0x10c9   : > { %v2530_v24 = vsub.f32 %v4590_v11, %v2527_v22  ;;  %v2537_v25 = vsel %vm1045_vm3, %v2532_v23, 0.0 }
0x10ca   : > { %2538 = vadd.xlane.f32.xlu1 %v2537_v25 }
0x10cb   : > { %v2533_v26 = vmul.f32 %v2530_v24, %v2530_v24 }
0x10cd   : > { %v2540_v27 = vsel %vm1052_vm4, %v2533_v26, 0.0 }
0x10ce   : > { %2541 = vadd.xlane.f32.xlu0 %v2540_v27 }
0x1153   : > { %v2536_v30 = vpop.xlane.xlu0 %2535 }
0x1154   : > { %v2543_v31 = vmul.f32 0.03125, %v2536_v30 }
0x1156   : > { %v2546_v32 = vadd.f32 1e-05, %v2543_v31 }
0x1157   : > { %v2539_v33 = vpop.xlane.xlu1 %2538 }
0x1158   : > { %3855 = vrsqrt.f32 %v2546_v32  ;;  %v2544_v34 = vmul.f32 0.03125, %v2539_v33 }
0x115a   : > { %v2547_v35 = vadd.f32 1e-05, %v2544_v34 }
0x115b   : > { %v2542_v36 = vpop.xlane.xlu0 %2541 }
0x115c   : > { %3857 = vrsqrt.f32 %v2547_v35  ;;  %v2545_v50 = vmul.f32 0.03125, %v2542_v36 }
0x115e   : > { %v2548_v44 = vadd.f32 1e-05, %v2545_v50 }
0x1160   : > { %3859 = vrsqrt.f32 %v2548_v44 }
0x1162   : > { %v3856_v37 = vpop.eup %3855 }
0x1163   : > { %v2552_v38 = vmul.f32 %v3856_v37, %v2528_v15  ;;  %v3278_v37 = vld [vmem:[%s868_s21] ss:$0 sm:$0xff] }
0x1165   : > { %v2561_v59 = vmul.f32 %v3271_v62, %v2552_v38 }
0x1166   : > { %v3858_v39 = vpop.eup %3857 }
0x1167   : > { %v2553_v1 = vmul.f32 %v3858_v39, %v2529_v19  ;;  %v2570_v41 = vadd.f32 %v3272_v58, %v2561_v59 }
0x1169   : > { %v2562_v4 = vmul.f32 %v3271_v62, %v2553_v1 }
0x116a   : > { %v3860_v40 = vpop.eup %3859 }
0x116b   : > { %v2554_v60 = vmul.f32 %v3860_v40, %v2530_v24  ;;  %v2571_v43 = vadd.f32 %v3272_v58, %v2562_v4 }
0x116d   : > { %v2563_v45 = vmul.f32 %v3271_v62, %v2554_v60  ;;  %v2573_v46 = vpack.c.bf16 %v2571_v43, %v2570_v41 }
0x116f   : > { %v2572_v47 = vadd.f32 %v3272_v58, %v2563_v45  ;;  %3580 = vmatprep.mubr.msk.bf16.mxu1 %vm1045_vm3, %v2573_v46 }
0x1171   : > { %v2574_v48 = vpack.c.bf16 %v2572_v47, %v2572_v47 }
0x1173   : > { %3581 = vmatmul.mubr.msk.bf16.vlgmr.msra.gmra.mrb[44].mxu1 %vm1045_vm3, %v2574_v48 }
0x1246   : > { %v3582_v51 = vpop.f32.mrb[44].mxu1 }
0x1247   : > { %v2647_v0 = vadd.f32 %v3582_v51, %v3273_v42  ;;  %v2638_v2 = vpop.f32.mrb[45].mxu1 }
0x1248   : > { %v2639_v3 = vadd.f32 %v3273_v42, %v2638_v2  ;;  %v3583_v6 = vpop.f32.mrb[46].mxu1  ;;  %v4020_v2 = vmov (!%p3287_p1), 0.0  }
0x1249   : > { %v2654_v7 = vmul.f32 %v2647_v0, %v2647_v0  ;;  %v2641_v8 = vpop.f32.mrb[47].mxu1  ;;  %3604 = vmatprep.subr.bf16.mxu0 (!%p3287_p1), %v4020_v2 }
0x124a   : > { %v2652_v9 = vmul.f32 %v2639_v3, %v2639_v3  ;;  %v2642_v10 = vadd.f32 %v3273_v42, %v2641_v8 }
0x124b   : > { %v2657_v12 = vmul.f32 %v2654_v7, %v2647_v0 }
0x124c   : > { %v2655_v13 = vmul.f32 %v2652_v9, %v2639_v3  ;;  %v2653_v14 = vmul.f32 %v2642_v10, %v2642_v10 }
0x124d   : > { %v2660_v15 = vmul.f32 0.044715, %v2657_v12 }
0x124e   : > { %v2658_v16 = vmul.f32 0.044715, %v2655_v13  ;;  %v2656_v17 = vmul.f32 %v2653_v14, %v2642_v10 }
0x124f   : > { %v2663_v18 = vadd.f32 %v2660_v15, %v2647_v0 }
0x1250   : > { %v2661_v19 = vadd.f32 %v2658_v16, %v2639_v3  ;;  %v2659_v20 = vmul.f32 0.044715, %v2656_v17  ;;  %v3288_v17 = vld [vmem:[%s4856_s25] ss:$0 sm:$0xff] (!%p3287_p1) }
0x1251   : > { %v2666_v21 = vmul.f32 0.7978846, %v2663_v18 }
0x1252   : > { %v2664_v22 = vmul.f32 0.7978846, %v2661_v19  ;;  %v2662_v23 = vadd.f32 %v2659_v20, %v2642_v10  ;;  %v3289_v19 = vld [vmem:[%s4857_s5] ss:$0 sm:$0xff] (!%p3287_p1) }
0x1253   : > { %3861 = vtanh.f32 %v2666_v21 }
0x1254   : > { %3863 = vtanh.f32 %v2664_v22  ;;  %v2665_v24 = vmul.f32 0.7978846, %v2662_v23 }
0x1256   : > { %3865 = vtanh.f32 %v2665_v24 }
0x125d   : > { %v3862_v25 = vpop.eup %3861 }
0x125e   : > { %v3864_v26 = vpop.eup %3863  ;;  %v2672_v27 = vadd.f32 1.0, %v3862_v25 }
0x125f   : > { %v2670_v28 = vadd.f32 1.0, %v3864_v26 }
0x1260   : > { %v3866_v29 = vpop.eup %3865  ;;  %v2675_v30 = vmul.f32 0.5, %v2672_v27 }
0x1261   : > { %v2671_v31 = vadd.f32 1.0, %v3866_v29  ;;  %v2673_v32 = vmul.f32 0.5, %v2670_v28 }
0x1262   : > { %v2678_v34 = vmul.f32 %v2675_v30, %v2647_v0  ;;  %v3870_v0 = vld [vmem:[%s4854_s26] sm:$0xff] (!%p3287_p1)  }
0x1263   : > { %v2674_v33 = vmul.f32 0.5, %v2671_v31  ;;  %v2676_v35 = vmul.f32 %v2673_v32, %v2639_v3  ;;  %v3871_v3 = vld [vmem:[%s4855_s22 + $0x8] sm:$0xff] (!%p3287_p1)  }
0x1264   : > { %v2680_v44 = vpack.c.bf16 %v2678_v34, %v2678_v34 }
0x1265   : > { %v2677_v36 = vmul.f32 %v2674_v33, %v2642_v10 }
0x1267   : > { %v2679_v50 = vpack.c.bf16 %v2677_v36, %v2676_v35 }
0x1269   : > { %3600 = vmatprep.mubr.bf16.mxu0 %v2679_v50 }
0x126a   : > { %3601 = vmatmul.mubr.bf16.vlgmr.msra.gmra.mrb[36].mxu0 %v2680_v44 }
0x126b   : > { %3608 = vmatprep.mubr.msk.bf16.mxu0 (!%p3287_p1), %vm4021_vm11, %v4020_v2  ;;  %3605 = vmatpush3.bf16.msra.mxu0 (!%p3287_p1), %v3870_v0 }
0x126c   : > { %3606 = vmatprep.subr.bf16.mxu0 (!%p3287_p1), %v4020_v2 }
0x126f   : > { %3607 = vmatpush3.bf16.msra.mxu0 (!%p3287_p1), %v3871_v3 }
0x133d   : > { %v3602_v38 = vpop.f32.mrb[36].mxu0 }
0x133e   : > { %v2795_v62 = vadd.f32 %v3602_v38, %v3278_v37  ;;  %v2786_v39 = vpop.f32.mrb[37].mxu0 }
0x133f   : > { %v2787_v1 = vadd.f32 %v3278_v37, %v2786_v39  ;;  %v3603_v59 = vpop.f32.mrb[38].mxu0  ;;  %2809 = sbr.rel (%p3287_p1) target bundleno = 5461 (0x1555), region = 108 }
0x1340   : > { %v2802_v58 = vadd.f32 %v2795_v62, %v4590_v11  ;;  %v2789_v4 = vpop.f32.mrb[39].mxu0 }
0x1341   : > { %v2800_v40 = vadd.f32 %v2787_v1, %v4582_v61  ;;  %v2790_v60 = vadd.f32 %v3278_v37, %v2789_v4 }
0x1342   : > { %2805 = vst.msk [vmem:[#allocation2 + $0x10] sm:$0x1] %vm1052_vm4, %v2802_v58  ;;  %v2818_v61 = vsel (!%p3287_p1), %vm1052_vm4, %v2802_v58, 0.0 }
0x1343   : > { %2803 = vst.msk [vmem:[#allocation2] sm:$0xff] %vm1045_vm3, %v2800_v40  ;;  %v2801_v41 = vadd.f32 %v2790_v60, %v4586_v5  ;;  %v2812_v43 = vsel (!%p3287_p1), %vm1045_vm3, %v2800_v40, 0.0 }
0x1344   : > { %2813 = vadd.xlane.f32.xlu0 (!%p3287_p1), %v2812_v43 }
0x1345   : > { %2804 = vst.msk [vmem:[#allocation2 + $0x8] sm:$0xff] %vm1045_vm3, %v2801_v41  ;;  %v2815_v45 = vsel (!%p3287_p1), %vm1045_vm3, %v2801_v41, 0.0 }
0x1346   : > { %2816 = vadd.xlane.f32.xlu1 %v2815_v45 }
0x134a   : > { %2819 = vadd.xlane.f32.xlu1 %v2818_v61 }
0x13d1   : > { %v2814_v11 = vpop.xlane.xlu0 %2813 }
0x13d2   : > { %v2821_v47 = vmul.f32 0.03125, %v2814_v11 }
0x13d3   : > { %v2817_v46 = vpop.xlane.xlu1 %2816 }
0x13d4   : > { %v2822_v48 = vmul.f32 0.03125, %v2817_v46  ;;  %v2824_v55 = vsub.f32 %v2800_v40, %v2821_v47 }
0x13d6   : > { %v2825_v5 = vsub.f32 %v2801_v41, %v2822_v48  ;;  %v2827_v52 = vmul.f32 %v2824_v55, %v2824_v55 }
0x13d7   : > { %v2820_v49 = vpop.xlane.xlu1 %2819 }
0x13d8   : > { %v2823_v53 = vmul.f32 0.03125, %v2820_v49  ;;  %v2828_v54 = vmul.f32 %v2825_v5, %v2825_v5  ;;  %v2830_v56 = vsel %vm1045_vm3, %v2827_v52, 0.0 }
0x13d9   : > { %2831 = vadd.xlane.f32.xlu0 %v2830_v56 }
0x13da   : > { %v2826_v57 = vsub.f32 %v2802_v58, %v2823_v53  ;;  %v2833_v63 = vsel %vm1045_vm3, %v2828_v54, 0.0 }
0x13dc   : > { %v2829_v42 = vmul.f32 %v2826_v57, %v2826_v57 }
0x13dd   : > { %2834 = vadd.xlane.f32.xlu0 %v2833_v63 }
0x13de   : > { %v2836_v51 = vsel %vm1052_vm4, %v2829_v42, 0.0 }
0x13df   : > { %2837 = vadd.xlane.f32.xlu1 %v2836_v51 }
0x1466   : > { %v2832_v6 = vpop.xlane.xlu0 %2831 }
0x1467   : > { %v2839_v7 = vmul.f32 0.03125, %v2832_v6 }
0x1469   : > { %v2842_v8 = vadd.f32 1e-05, %v2839_v7 }
0x146a   : > { %v2835_v9 = vpop.xlane.xlu0 %2834 }
0x146b   : > { %3872 = vrsqrt.f32 %v2842_v8  ;;  %v2840_v12 = vmul.f32 0.03125, %v2835_v9 }
0x146c   : > { %v2838_v10 = vpop.xlane.xlu1 %2837 }
0x146d   : > { %v2841_v13 = vmul.f32 0.03125, %v2838_v10  ;;  %v2843_v14 = vadd.f32 1e-05, %v2840_v12 }
0x146f   : > { %v2844_v15 = vadd.f32 1e-05, %v2841_v13  ;;  %3874 = vrsqrt.f32 %v2843_v14 }
0x1471   : > { %3876 = vrsqrt.f32 %v2844_v15 }
0x1475   : > { %v3873_v16 = vpop.eup %3872 }
0x1476   : > { %v2848_v18 = vmul.f32 %v3873_v16, %v2824_v55 }
0x1478   : > { %v2857_v20 = vmul.f32 %v3288_v17, %v2848_v18 }
0x1479   : > { %v3875_v21 = vpop.eup %3874 }
0x147a   : > { %v2866_v23 = vadd.f32 %v3289_v19, %v2857_v20  ;;  %v2849_v24 = vmul.f32 %v3875_v21, %v2825_v5 }
0x147b   : > { %v3877_v22 = vpop.eup %3876 }
0x147c   : > { %v2850_v25 = vmul.f32 %v3877_v22, %v2826_v57  ;;  %2869 = vst.msk [vmem:[%s4275_s18] sm:$0xff] %vm1045_vm3, %v2866_v23  ;;  %v2872_v26 = vpack.c.bf16 %v2866_v23, %v2866_v23  ;;  %v2858_v27 = vmul.f32 %v3288_v17, %v2849_v24 }
0x147e   : > { %v2859_v28 = vmul.f32 %v3288_v17, %v2850_v25  ;;  %3609 = vmatmul.mubr.msk.bf16.vlgmr.msra.gmra.mrb[0].mxu0 %vm1045_vm3, %v2872_v26  ;;  %v2867_v29 = vadd.f32 %v3289_v19, %v2858_v27 }
0x1480   : > { %v2868_v30 = vadd.f32 %v3289_v19, %v2859_v28  ;;  %2870 = vst.msk [vmem:[%s4275_s18 + $0x8] sm:$0xff] %vm1045_vm3, %v2867_v29 }
0x1482   : > { %2871 = vst.msk [vmem:[%s4275_s18 + $0x10] sm:$0x1] %vm1052_vm4, %v2868_v30 }
0x1551   : > { %v2926_v31 = vpop.f32.mrb[0].mxu0 }
0x1552   : > { %2933 = vst.msk [vmem:[%s819_s23] sm:$0x1] %vm2932_vm12, %v2926_v31  ;;  %v3610_v32 = vpop.f32.mrb[1].mxu0 }
0x1553   : > { %v2929_v33 = vpop.f32.mrb[2].mxu0 }
0x1554   : > { %v3611_v34 = vpop.f32.mrb[3].mxu0 }
0x1555 PF: > { %s4858_s9 = sld [smem:[#allocation13_spill]]  ;;  %s2952_s20 = sshll.u32 %s4275_s18, 4  ;;  %s4673_s20 = int_to_ptr.vmem [resolvable:$true] %s2952_s20 }
0x1556   : > { %s4860_s28 = sld [smem:[#allocation36_spill]]  ;;  %s2935_s7 = scalar_lea.sflag [#allocation4], %s4206_s30 }
0x1557   : > { %s3878_s2 = scalar_lea.vmem %s4673_s20, 384  ;;  %s4022_s27 = smov [#allocation3]  }
0x1558   : > { %p3879_p2 = scmp.ne.s32.totalorder %s4673_s20, %s3878_s2  ;;  %s3882_s25 = sshll.u32 %s4022_s27, 4  ;;  %s3883_s25 = int_to_ptr.vmem [resolvable:$false] %s3882_s25 }
0x1559   : > { %s3884_s18 = scalar_lea.vmem %s3883_s25, 768  ;;  %p3885_p6 = scmp.lt.s32.totalorder %s4673_s20, %s3883_s25 }
0x155a   : > { %p3880_p4 = pnand %p3879_p2, %p4185_p3  ;;  %p3886_p7 = scmp.lt.s32.totalorder %s3884_s18, %s3878_s2 }
0x155b   : > { %s3642_s3 = smul.u32 384, %s4858_s9 }
0x155c   : > { %s4861_s17 = smov %s4860_s28  ;;  %p3881_p5 = pneg %p3880_p4 }
0x155d   : > { %s4671_s26 = scalar_lea.hbm %s4860_s28, %s3642_s3  ;;  %p3887_p8 = por %p3886_p7, %p3885_p6 }
0x155f   : > { %p3888_p10 = pnand %p3887_p8, %p3881_p5 }
0x1561   : > { %3891 = shalt.err (!%p3888_p10)
}
0x1562   : > { %s3892_s19 = scalar_lea.hbm %s4671_s26, 384  ;;  %s3896_s3 = scalar_lea.hbm %s4861_s17, 768 }
0x1563   : > { %p3893_p11 = scmp.ne.s32.totalorder %s4671_s26, %s3892_s19  ;;  %p3897_p0 = scmp.lt.u32.totalorder %s4671_s26, %s4861_s17 }
0x1564   : > { %p3898_p1 = scmp.lt.u32.totalorder %s3896_s3, %s3892_s19  ;;  %p3900_p4 = scmp.lt.u32.totalorder %s3892_s19, %s4671_s26 }
0x1565   : > { %p3894_p12 = pnand %p3893_p11, %p4185_p3 }
0x1566   : > { %p3899_p2 = por %p3898_p1, %p3897_p0 }
0x1567   : > { %p3895_p13 = pneg %p3894_p12 }
0x1568   : > { %p3901_p5 = por %p3900_p4, %p3899_p2 }
0x156a   : > { %p3902_p6 = pnand %p3901_p5, %p3895_p13 }
0x156c   : > { %3905 = shalt.err (!%p3902_p6)
}
0x156d   : > { %s4023_s28 = smov 128   ;;  %s4024_s2 = smov 8  }
0x156e   : > { %3643 = dma.vmem_to_hbm [thread:$0]  (%p4185_p3), %s4673_s20, 384, %s4671_s26, %s2935_s7, %s4023_s28, %s4023_s28, %s4024_s2  }
0x156f   : > { %s3294_s27 = sshll.u32 %s4858_s9, 4  ;;  %s2968_s25 = sshll.u32 %s819_s23, 4  ;;  %s2969_s25 = int_to_ptr.vmem [resolvable:$true] %s2968_s25 }
0x1570   : > { %s4862_s29 = sld [smem:[#allocation37_spill]]  ;;  %s2940_s0 = scalar_lea.sflag [#allocation6], %s4206_s30 }
0x1571   : > { %s3906_s21 = scalar_lea.vmem %s2969_s25, 16  ;;  %s4025_s1 = smov [#allocation5]  }
0x1572   : > { %p3907_p7 = scmp.ne.s32.totalorder %s2969_s25, %s3906_s21  ;;  %s3910_s6 = sshll.u32 %s4025_s1, 4  ;;  %s3911_s6 = int_to_ptr.vmem [resolvable:$false] %s3910_s6 }
0x1573   : > { %s3912_s8 = scalar_lea.vmem %s3911_s6, 32  ;;  %p3913_p11 = scmp.lt.s32.totalorder %s2969_s25, %s3911_s6 }
0x1574   : > { %p3908_p8 = pnand %p3907_p7, %p4185_p3  ;;  %p3914_p12 = scmp.lt.s32.totalorder %s3912_s8, %s3906_s21 }
0x1576   : > { %s4863_s5 = smov %s4862_s29  ;;  %s4705_s3 = scalar_lea.hbm %s4862_s29, %s3294_s27 }
0x1577   : > { %p3909_p10 = pneg %p3908_p8  ;;  %p3915_p13 = por %p3914_p12, %p3913_p11 }
0x1579   : > { %p3916_p0 = pnand %p3915_p13, %p3909_p10 }
0x157b   : > { %3919 = shalt.err (!%p3916_p0)
}
0x157c   : > { %s3920_s30 = scalar_lea.hbm %s4705_s3, 16  ;;  %s3924_s1 = scalar_lea.hbm %s4863_s5, 32 }
0x157d   : > { %p3921_p1 = scmp.ne.s32.totalorder %s4705_s3, %s3920_s30  ;;  %p3925_p5 = scmp.lt.u32.totalorder %s4705_s3, %s4863_s5 }
0x157e   : > { %p3926_p6 = scmp.lt.u32.totalorder %s3924_s1, %s3920_s30  ;;  %p3928_p8 = scmp.lt.u32.totalorder %s3920_s30, %s4705_s3 }
0x157f   : > { %p3922_p2 = pnand %p3921_p1, %p4185_p3 }
0x1580   : > { %p3927_p7 = por %p3926_p6, %p3925_p5 }
0x1581   : > { %p3923_p4 = pneg %p3922_p2 }
0x1582   : > { %p3929_p10 = por %p3928_p8, %p3927_p7 }
0x1584   : > { %p3930_p11 = pnand %p3929_p10, %p3923_p4 }
0x1586   : > { %3933 = shalt.err (!%p3930_p11)
}
0x1587   : > { %3644 = dma.vmem_to_hbm [thread:$0]  (%p4185_p3), %s2969_s25, 16, %s4705_s3, %s2940_s0  }
0x1588 PF: > { %s4864_s8 = sld [smem:[#allocation16_spill]]  ;;  %s4865_s26 = sld [smem:[#allocation9_spill]] }
0x158e   : > { %p3654_p12 = scmp.ge.s32.totalorder %s4864_s8, 2  ;;  %s2980_s28 = sand.u32 1, %s4865_s26  }
0x158f   : > { %s2981_s2 = scalar_lea.sflag [#allocation4], %s2980_s28 }
0x1590   : > { %p3648_p13 = pnand %p3654_p12, %p4195_p9 }
0x1592   : > { %3967 = dma.done.wait (!%p3648_p13), %s2981_s2, 384  }
0x1593   : > { %3969 = vsyncadd (!%p3648_p13), %s2981_s2, 4294966912  ;;  %s2990_s27 = scalar_lea.sflag [#allocation6], %s2980_s28 }
0x1594   : > { %3971 = dma.done.wait (!%p3648_p13), %s2990_s27, 16  }
0x1595   : > { %3973 = vsyncadd (!%p3648_p13), %s2990_s27, 4294967280  ;;  %s38_s0 = sadd.s32 1, %s4864_s8   ;;  %s4867_s2 = sld [smem:[#allocation10_spill]] }
0x1596   : > { %p35_p0 = scmp.ge.s32.totalorder %s38_s0, 6   ;;  %s4868_s25 = sld [smem:[#allocation11_spill]] }
0x1597   : > { %s4869_s26 = sld [smem:[#allocation21_spill]]  ;;  %s4870_s27 = sld [smem:[#allocation14_spill]] }
0x1598   : > { %s4871_s3 = sld [smem:[#allocation15_spill]]  ;;  %s4872_s28 = sld [smem:[#allocation17_spill]] }
0x1599   : > { %s4873_s29 = sld [smem:[#allocation19_spill]]  ;;  %37 = sbr.rel (!%p35_p0) target bundleno = 23 (0x17), region = 196 }
0x15a0   :  { %2994 = vsyncpa [#allocation4], 1 }
0x15a1   :  { %2996 = vsyncpa [#allocation4 + $0x1], 1 }
0x15a2   :  { %2997 = vsyncpa [#allocation6], 1 }
0x15a3   :  { %2999 = vsyncpa [#allocation6 + $0x1], 1 }

</bundles_post_ra>
